<compile_context>
chip_gen: v7x
topology: tpu7x:2x2x1
jax: 0.10.0
libtpu: 0.0.40
codegen_flags: <defaults>
</compile_context>

<pallas_src>
import functools

import jax
import jax.numpy as jnp
import numpy as np
from jax import lax
from jax.experimental import pallas as pl
from jax.experimental.pallas import tpu as pltpu


def _bottleneck_kernel(x_ref, w1_ref, s1_ref, b1_ref,
                       w2_ref, s2_ref, b2_ref,
                       w3_ref, s3_ref, b3_ref,
                       o_ref):
    """One batch image per grid step.  All weights live fully in VMEM."""
    _, H, W, Cin = x_ref.shape
    P = w1_ref.shape[1]
    HW = H * W

    xm = x_ref[0].reshape(HW, Cin)                       # (HW, Cin) bf16, C on lanes

    # ---- conv1 (1x1) + bn1 + relu : channel matmul ---------------------------
    h1 = jnp.dot(xm, w1_ref[...], preferred_element_type=jnp.float32)
    h1 = jnp.maximum(h1 * s1_ref[...] + b1_ref[...], 0.0)          # (HW, P) f32

    # ---- conv2 (3x3, stride 1, pad 1) + bn2 + relu, via im2col ---------------
    # Build the (HW, 9P) patch slab with shifted copies of h1 (rolls + boundary
    # masks — no misaligned padded scratch), then one K=9P MXU matmul.
    h1_3d = h1.reshape(H, W, P)
    hh = lax.broadcasted_iota(jnp.int32, (H, W, 1), 0)
    ww = lax.broadcasted_iota(jnp.int32, (H, W, 1), 1)

    taps = []
    for kh in range(3):
        dh = kh - 1
        for kw in range(3):
            dw = kw - 1
            tap = h1_3d                                   # tap[h,w] = h1[h+dh, w+dw]
            if dh != 0:
                tap = jnp.roll(tap, -dh, axis=0)
            if dw != 0:
                tap = jnp.roll(tap, -dw, axis=1)
            conds = []
            if dh == -1:
                conds.append(hh >= 1)
            elif dh == 1:
                conds.append(hh <= H - 2)
            if dw == -1:
                conds.append(ww >= 1)
            elif dw == 1:
                conds.append(ww <= W - 2)
            if conds:
                mask = functools.reduce(jnp.logical_and, conds)
                tap = jnp.where(mask, tap, 0.0)
            taps.append(tap.astype(jnp.bfloat16))

    patches = jnp.concatenate(taps, axis=2).reshape(HW, 9 * P)      # (HW, 9P) bf16
    h2 = jnp.dot(patches, w2_ref[...], preferred_element_type=jnp.float32)
    h2 = jnp.maximum(h2 * s2_ref[...] + b2_ref[...], 0.0)           # (HW, P) f32

    # ---- conv3 (1x1) + bn3 ---------------------------------------------------
    h3 = jnp.dot(h2.astype(jnp.bfloat16), w3_ref[...],
                 preferred_element_type=jnp.float32)
    h3 = h3 * s3_ref[...] + b3_ref[...]                              # (HW, 4P) f32

    # ---- residual add + relu (f32) -------------------------------------------
    out = jnp.maximum(h3 + xm.astype(jnp.float32), 0.0)
    o_ref[0] = out.reshape(H, W, 4 * P)


def bottleneck_pallas_nhwc(x_nhwc, params):
    """x_nhwc: (N, H, W, Cin).  Returns (N, H, W, Cin) float32."""
    (w1, s1, b1, w2, s2, b2, w3, s3, b3) = params
    N, H, W, Cin = x_nhwc.shape
    P = w1.shape[1]
    Cout = 4 * P
    assert Cin == Cout, "identity residual requires inplanes == 4*planes"

    x_bf = x_nhwc.astype(jnp.bfloat16)                 # halves input HBM->VMEM DMA

    full = lambda shape: pl.BlockSpec(shape, lambda n: tuple(0 for _ in shape))

    return pl.pallas_call(
        _bottleneck_kernel,
        out_shape=jax.ShapeDtypeStruct((N, H, W, Cout), jnp.float32),
        grid=(N,),
        in_specs=[
            pl.BlockSpec((1, H, W, Cin), lambda n: (n, 0, 0, 0)),
            full((Cin, P)),                             # w1   (bf16)
            full((1, P)), full((1, P)),                 # s1, b1 (f32)
            full((9 * P, P)),                           # w2 im2col weight (bf16)
            full((1, P)), full((1, P)),                 # s2, b2
            full((P, Cout)),                            # w3   (bf16)
            full((1, Cout)), full((1, Cout)),           # s3, b3
        ],
        out_specs=pl.BlockSpec((1, H, W, Cout), lambda n: (n, 0, 0, 0)),
        compiler_params=pltpu.CompilerParams(
            dimension_semantics=("parallel",),
            vmem_limit_bytes=48 * 1024 * 1024),
    )(x_bf, w1, s1, b1, w2, s2, b2, w3, s3, b3)


def bottleneck_pallas(x_nchw, params):
    """PyTorch-layout wrapper: (N, Cin, H, W) in / out.

    NOTE: these transposes are full-tensor HBM round trips; keep the
    surrounding model in NHWC and call bottleneck_pallas_nhwc to avoid them.
    """
    x_nhwc = jnp.transpose(x_nchw, (0, 2, 3, 1))
    out = bottleneck_pallas_nhwc(x_nhwc, params)
    return jnp.transpose(out, (0, 3, 1, 2))


# ------------------------- parameter construction ---------------------------

def _bn_fold(gamma, beta, mean, var, eps=1e-5):
    scale = gamma / jnp.sqrt(var + eps)
    bias = beta - mean * scale
    return (scale.reshape(1, -1).astype(jnp.float32),
            bias.reshape(1, -1).astype(jnp.float32))


def make_params(key, inplanes, planes):
    """Deterministic synthetic weights mirroring the nn.Module shapes."""
    k1, k2, k3 = jax.random.split(key, 3)
    # PyTorch conv weight layout: (Cout, Cin, kH, kW)
    w1_t = jax.random.normal(k1, (planes, inplanes, 1, 1), jnp.float32) / np.sqrt(inplanes)
    w2_t = jax.random.normal(k2, (planes, planes, 3, 3), jnp.float32) / np.sqrt(planes * 9)
    w3_t = jax.random.normal(k3, (planes * 4, planes, 1, 1), jnp.float32) / np.sqrt(planes)

    def bn_params(c, off):
        gamma = 1.0 + 0.01 * jnp.arange(c, dtype=jnp.float32)
        beta = 0.02 * jnp.arange(c, dtype=jnp.float32) - off
        mean = 0.03 * jnp.arange(c, dtype=jnp.float32)
        var = 1.0 + 0.05 * jnp.arange(c, dtype=jnp.float32)
        return gamma, beta, mean, var

    bn1 = bn_params(planes, 0.01)
    bn2 = bn_params(planes, 0.02)
    bn3 = bn_params(planes * 4, 0.03)

    # Kernel-layout weights: channels-last matmul operands, bf16 for the MXU.
    w1 = jnp.transpose(w1_t[:, :, 0, 0], (1, 0)).astype(jnp.bfloat16)   # (Cin, P)
    w2 = (jnp.transpose(w2_t, (2, 3, 1, 0))                              # (kH,kW,Cin,Cout)
          .reshape(9 * planes, planes).astype(jnp.bfloat16))             # (9P, P)
    w3 = jnp.transpose(w3_t[:, :, 0, 0], (1, 0)).astype(jnp.bfloat16)   # (P, 4P)

    s1, b1 = _bn_fold(*bn1)
    s2, b2 = _bn_fold(*bn2)
    s3, b3 = _bn_fold(*bn3)

    torch_layout = (w1_t, bn1, w2_t, bn2, w3_t, bn3)
    kernel_layout = (w1, s1, b1, w2, s2, b2, w3, s3, b3)
    return torch_layout, kernel_layout


# ------------------------------ JAX reference --------------------------------

def bottleneck_reference(x, torch_params, eps=1e-5):
    """Pure-JAX NCHW f32 reference matching the PyTorch module (eval-mode BN)."""
    w1_t, bn1, w2_t, bn2, w3_t, bn3 = torch_params

    def conv(x, w, stride=1, pad=0):
        return lax.conv_general_dilated(
            x, w, window_strides=(stride, stride),
            padding=[(pad, pad), (pad, pad)],
            dimension_numbers=("NCHW", "OIHW", "NCHW"))

    def bn(x, p):
        gamma, beta, mean, var = p
        sc = (gamma / jnp.sqrt(var + eps)).reshape(1, -1, 1, 1)
        bs = (beta - mean * gamma / jnp.sqrt(var + eps)).reshape(1, -1, 1, 1)
        return x * sc + bs

    out = jax.nn.relu(bn(conv(x, w1_t), bn1))
    out = jax.nn.relu(bn(conv(out, w2_t, stride=1, pad=1), bn2))
    out = bn(conv(out, w3_t), bn3)
    return jax.nn.relu(out + x)


# ----------------------------------- main ------------------------------------

if __name__ == "__main__":
    # NOTE: toy shape for the correctness check only — do not tune tiles on it
    # (real ResNet stages have P>=64, Cout>=256, lane-dense outputs).
    N, planes, H, W = 2, 4, 16, 16
    inplanes = planes * 4          # identity residual (stride=1, downsample=None)

    key = jax.random.PRNGKey(0)
    kx, kw = jax.random.split(key)
    x = jax.random.normal(kx, (N, inplanes, H, W), jnp.float32)

    torch_params, kernel_params = make_params(kw, inplanes, planes)

    out = bottleneck_pallas(x, kernel_params)
    out = jax.block_until_ready(out)

    ref = bottleneck_reference(x, torch_params)
    # bf16 matmul operands (f32 accumulation) across three chained convs ->
    # loosened tolerance vs. the pure-f32 reference.
    np.testing.assert_allclose(np.asarray(out), np.asarray(ref), rtol=5e-2, atol=5e-2)

    print("KERNEL_OK")
</pallas_src>

<mosaic_0001>
module attributes {stable_mosaic.version = 11 : i64} {
  func.func @_bottleneck_kernel(%arg0: i32, %arg1: memref<1x16x16x16xbf16, #tpu.memory_space<vmem>>, %arg2: memref<16x4xbf16, #tpu.memory_space<vmem>>, %arg3: memref<1x4xf32, #tpu.memory_space<vmem>>, %arg4: memref<1x4xf32, #tpu.memory_space<vmem>>, %arg5: memref<36x4xbf16, #tpu.memory_space<vmem>>, %arg6: memref<1x4xf32, #tpu.memory_space<vmem>>, %arg7: memref<1x4xf32, #tpu.memory_space<vmem>>, %arg8: memref<4x16xbf16, #tpu.memory_space<vmem>>, %arg9: memref<1x16xf32, #tpu.memory_space<vmem>>, %arg10: memref<1x16xf32, #tpu.memory_space<vmem>>, %arg11: memref<1x16x16x16xf32, #tpu.memory_space<vmem>>) attributes {dimension_semantics = [#tpu.dimension_semantics<parallel>], iteration_bounds = array<i64: 2>, scalar_prefetch = 0 : i64, scratch_operands = 0 : i64, tpu.core_type = #tpu.core_type<tc>, window_params = [{transform_indices = @transform_0, window_bounds = array<i64: 1, 16, 16, 16>}, {pipeline_mode = #tpu.pipeline_mode<synchronous>, transform_indices = @transform_1, window_bounds = array<i64: 16, 4>}, {pipeline_mode = #tpu.pipeline_mode<synchronous>, transform_indices = @transform_2, window_bounds = array<i64: 1, 4>}, {pipeline_mode = #tpu.pipeline_mode<synchronous>, transform_indices = @transform_3, window_bounds = array<i64: 1, 4>}, {pipeline_mode = #tpu.pipeline_mode<synchronous>, transform_indices = @transform_4, window_bounds = array<i64: 36, 4>}, {pipeline_mode = #tpu.pipeline_mode<synchronous>, transform_indices = @transform_5, window_bounds = array<i64: 1, 4>}, {pipeline_mode = #tpu.pipeline_mode<synchronous>, transform_indices = @transform_6, window_bounds = array<i64: 1, 4>}, {pipeline_mode = #tpu.pipeline_mode<synchronous>, transform_indices = @transform_7, window_bounds = array<i64: 4, 16>}, {pipeline_mode = #tpu.pipeline_mode<synchronous>, transform_indices = @transform_8, window_bounds = array<i64: 1, 16>}, {pipeline_mode = #tpu.pipeline_mode<synchronous>, transform_indices = @transform_9, window_bounds = array<i64: 1, 16>}, {transform_indices = @transform_10, window_bounds = array<i64: 1, 16, 16, 16>}]} {
    %c0 = arith.constant 0 : index
    %c0_0 = arith.constant 0 : index
    %c0_1 = arith.constant 0 : index
    %c0_2 = arith.constant 0 : index
    %0 = vector.load %arg1[%c0, %c0_0, %c0_1, %c0_2] : memref<1x16x16x16xbf16, #tpu.memory_space<vmem>>, vector<1x16x16x16xbf16>
    %1 = vector.shape_cast %0 : vector<1x16x16x16xbf16> to vector<16x16x16xbf16>
    %2 = vector.shape_cast %1 : vector<16x16x16xbf16> to vector<256x16xbf16>
    %c0_3 = arith.constant 0 : index
    %c0_4 = arith.constant 0 : index
    %3 = vector.load %arg2[%c0_3, %c0_4] : memref<16x4xbf16, #tpu.memory_space<vmem>>, vector<16x4xbf16>
    %cst = arith.constant dense<0.000000e+00> : vector<256x4xf32>
    %4 = tpu.matmul %2, %3, %cst {dimension_numbers = #tpu.dot_dimension_numbers<[1], [0], [0], [1], [0, 0, 1, 1], [], []>} : vector<256x16xbf16>, vector<16x4xbf16>, vector<256x4xf32> -> vector<256x4xf32>
    %c0_5 = arith.constant 0 : index
    %c0_6 = arith.constant 0 : index
    %5 = vector.load %arg3[%c0_5, %c0_6] : memref<1x4xf32, #tpu.memory_space<vmem>>, vector<1x4xf32>
    %6 = vector.broadcast %5 : vector<1x4xf32> to vector<256x4xf32>
    %7 = arith.mulf %4, %6 : vector<256x4xf32>
    %c0_7 = arith.constant 0 : index
    %c0_8 = arith.constant 0 : index
    %8 = vector.load %arg4[%c0_7, %c0_8] : memref<1x4xf32, #tpu.memory_space<vmem>>, vector<1x4xf32>
    %9 = vector.broadcast %8 : vector<1x4xf32> to vector<256x4xf32>
    %10 = arith.addf %7, %9 : vector<256x4xf32>
    %cst_9 = arith.constant 0.000000e+00 : f32
    %11 = vector.broadcast %cst_9 : f32 to vector<256x4xf32>
    %12 = arith.maximumf %10, %11 : vector<256x4xf32>
    %13 = vector.shape_cast %12 : vector<256x4xf32> to vector<16x16x4xf32>
    %14 = tpu.iota {dimensions = array<i32: 0>} : vector<16x16x1xi32>
    %15 = tpu.iota {dimensions = array<i32: 1>} : vector<16x16x1xi32>
    %16 = vector.extract_strided_slice %13 {offsets = [15, 0, 0], sizes = [1, 16, 4], strides = [1, 1, 1]} : vector<16x16x4xf32> to vector<1x16x4xf32>
    %17 = vector.extract_strided_slice %13 {offsets = [0, 0, 0], sizes = [15, 16, 4], strides = [1, 1, 1]} : vector<16x16x4xf32> to vector<15x16x4xf32>
    %18 = tpu.concatenate %16, %17 in 0 : vector<1x16x4xf32>, vector<15x16x4xf32> -> vector<16x16x4xf32>
    %19 = vector.extract_strided_slice %18 {offsets = [0, 15, 0], sizes = [16, 1, 4], strides = [1, 1, 1]} : vector<16x16x4xf32> to vector<16x1x4xf32>
    %20 = vector.extract_strided_slice %18 {offsets = [0, 0, 0], sizes = [16, 15, 4], strides = [1, 1, 1]} : vector<16x16x4xf32> to vector<16x15x4xf32>
    %21 = tpu.concatenate %19, %20 in 1 : vector<16x1x4xf32>, vector<16x15x4xf32> -> vector<16x16x4xf32>
    %c1_i32 = arith.constant 1 : i32
    %22 = vector.broadcast %c1_i32 : i32 to vector<16x16x1xi32>
    %23 = arith.cmpi sge, %14, %22 : vector<16x16x1xi32>
    %c1_i32_10 = arith.constant 1 : i32
    %24 = vector.broadcast %c1_i32_10 : i32 to vector<16x16x1xi32>
    %25 = arith.cmpi sge, %15, %24 : vector<16x16x1xi32>
    %26 = arith.andi %23, %25 : vector<16x16x1xi1>
    %cst_11 = arith.constant 0.000000e+00 : f32
    %27 = vector.shape_cast %26 : vector<16x16x1xi1> to vector<16x16x1xi1>
    %28 = vector.broadcast %27 : vector<16x16x1xi1> to vector<16x16x4xi1>
    %29 = vector.broadcast %cst_11 : f32 to vector<16x16x4xf32>
    %30 = arith.select %28, %21, %29 : vector<16x16x4xi1>, vector<16x16x4xf32>
    %31 = arith.truncf %30 : vector<16x16x4xf32> to vector<16x16x4xbf16>
    %32 = vector.extract_strided_slice %13 {offsets = [15, 0, 0], sizes = [1, 16, 4], strides = [1, 1, 1]} : vector<16x16x4xf32> to vector<1x16x4xf32>
    %33 = vector.extract_strided_slice %13 {offsets = [0, 0, 0], sizes = [15, 16, 4], strides = [1, 1, 1]} : vector<16x16x4xf32> to vector<15x16x4xf32>
    %34 = tpu.concatenate %32, %33 in 0 : vector<1x16x4xf32>, vector<15x16x4xf32> -> vector<16x16x4xf32>
    %c1_i32_12 = arith.constant 1 : i32
    %35 = vector.broadcast %c1_i32_12 : i32 to vector<16x16x1xi32>
    %36 = arith.cmpi sge, %14, %35 : vector<16x16x1xi32>
    %cst_13 = arith.constant 0.000000e+00 : f32
    %37 = vector.shape_cast %36 : vector<16x16x1xi1> to vector<16x16x1xi1>
    %38 = vector.broadcast %37 : vector<16x16x1xi1> to vector<16x16x4xi1>
    %39 = vector.broadcast %cst_13 : f32 to vector<16x16x4xf32>
    %40 = arith.select %38, %34, %39 : vector<16x16x4xi1>, vector<16x16x4xf32>
    %41 = arith.truncf %40 : vector<16x16x4xf32> to vector<16x16x4xbf16>
    %42 = vector.extract_strided_slice %13 {offsets = [15, 0, 0], sizes = [1, 16, 4], strides = [1, 1, 1]} : vector<16x16x4xf32> to vector<1x16x4xf32>
    %43 = vector.extract_strided_slice %13 {offsets = [0, 0, 0], sizes = [15, 16, 4], strides = [1, 1, 1]} : vector<16x16x4xf32> to vector<15x16x4xf32>
    %44 = tpu.concatenate %42, %43 in 0 : vector<1x16x4xf32>, vector<15x16x4xf32> -> vector<16x16x4xf32>
    %45 = vector.extract_strided_slice %44 {offsets = [0, 1, 0], sizes = [16, 15, 4], strides = [1, 1, 1]} : vector<16x16x4xf32> to vector<16x15x4xf32>
    %46 = vector.extract_strided_slice %44 {offsets = [0, 0, 0], sizes = [16, 1, 4], strides = [1, 1, 1]} : vector<16x16x4xf32> to vector<16x1x4xf32>
    %47 = tpu.concatenate %45, %46 in 1 : vector<16x15x4xf32>, vector<16x1x4xf32> -> vector<16x16x4xf32>
    %c1_i32_14 = arith.constant 1 : i32
    %48 = vector.broadcast %c1_i32_14 : i32 to vector<16x16x1xi32>
    %49 = arith.cmpi sge, %14, %48 : vector<16x16x1xi32>
    %c14_i32 = arith.constant 14 : i32
    %50 = vector.broadcast %c14_i32 : i32 to vector<16x16x1xi32>
    %51 = arith.cmpi sle, %15, %50 : vector<16x16x1xi32>
    %52 = arith.andi %49, %51 : vector<16x16x1xi1>
    %cst_15 = arith.constant 0.000000e+00 : f32
    %53 = vector.shape_cast %52 : vector<16x16x1xi1> to vector<16x16x1xi1>
    %54 = vector.broadcast %53 : vector<16x16x1xi1> to vector<16x16x4xi1>
    %55 = vector.broadcast %cst_15 : f32 to vector<16x16x4xf32>
    %56 = arith.select %54, %47, %55 : vector<16x16x4xi1>, vector<16x16x4xf32>
    %57 = arith.truncf %56 : vector<16x16x4xf32> to vector<16x16x4xbf16>
    %58 = vector.extract_strided_slice %13 {offsets = [0, 15, 0], sizes = [16, 1, 4], strides = [1, 1, 1]} : vector<16x16x4xf32> to vector<16x1x4xf32>
    %59 = vector.extract_strided_slice %13 {offsets = [0, 0, 0], sizes = [16, 15, 4], strides = [1, 1, 1]} : vector<16x16x4xf32> to vector<16x15x4xf32>
    %60 = tpu.concatenate %58, %59 in 1 : vector<16x1x4xf32>, vector<16x15x4xf32> -> vector<16x16x4xf32>
    %c1_i32_16 = arith.constant 1 : i32
    %61 = vector.broadcast %c1_i32_16 : i32 to vector<16x16x1xi32>
    %62 = arith.cmpi sge, %15, %61 : vector<16x16x1xi32>
    %cst_17 = arith.constant 0.000000e+00 : f32
    %63 = vector.shape_cast %62 : vector<16x16x1xi1> to vector<16x16x1xi1>
    %64 = vector.broadcast %63 : vector<16x16x1xi1> to vector<16x16x4xi1>
    %65 = vector.broadcast %cst_17 : f32 to vector<16x16x4xf32>
    %66 = arith.select %64, %60, %65 : vector<16x16x4xi1>, vector<16x16x4xf32>
    %67 = arith.truncf %66 : vector<16x16x4xf32> to vector<16x16x4xbf16>
    %68 = arith.truncf %13 : vector<16x16x4xf32> to vector<16x16x4xbf16>
    %69 = vector.extract_strided_slice %13 {offsets = [0, 1, 0], sizes = [16, 15, 4], strides = [1, 1, 1]} : vector<16x16x4xf32> to vector<16x15x4xf32>
    %70 = vector.extract_strided_slice %13 {offsets = [0, 0, 0], sizes = [16, 1, 4], strides = [1, 1, 1]} : vector<16x16x4xf32> to vector<16x1x4xf32>
    %71 = tpu.concatenate %69, %70 in 1 : vector<16x15x4xf32>, vector<16x1x4xf32> -> vector<16x16x4xf32>
    %c14_i32_18 = arith.constant 14 : i32
    %72 = vector.broadcast %c14_i32_18 : i32 to vector<16x16x1xi32>
    %73 = arith.cmpi sle, %15, %72 : vector<16x16x1xi32>
    %cst_19 = arith.constant 0.000000e+00 : f32
    %74 = vector.shape_cast %73 : vector<16x16x1xi1> to vector<16x16x1xi1>
    %75 = vector.broadcast %74 : vector<16x16x1xi1> to vector<16x16x4xi1>
    %76 = vector.broadcast %cst_19 : f32 to vector<16x16x4xf32>
    %77 = arith.select %75, %71, %76 : vector<16x16x4xi1>, vector<16x16x4xf32>
    %78 = arith.truncf %77 : vector<16x16x4xf32> to vector<16x16x4xbf16>
    %79 = vector.extract_strided_slice %13 {offsets = [1, 0, 0], sizes = [15, 16, 4], strides = [1, 1, 1]} : vector<16x16x4xf32> to vector<15x16x4xf32>
    %80 = vector.extract_strided_slice %13 {offsets = [0, 0, 0], sizes = [1, 16, 4], strides = [1, 1, 1]} : vector<16x16x4xf32> to vector<1x16x4xf32>
    %81 = tpu.concatenate %79, %80 in 0 : vector<15x16x4xf32>, vector<1x16x4xf32> -> vector<16x16x4xf32>
    %82 = vector.extract_strided_slice %81 {offsets = [0, 15, 0], sizes = [16, 1, 4], strides = [1, 1, 1]} : vector<16x16x4xf32> to vector<16x1x4xf32>
    %83 = vector.extract_strided_slice %81 {offsets = [0, 0, 0], sizes = [16, 15, 4], strides = [1, 1, 1]} : vector<16x16x4xf32> to vector<16x15x4xf32>
    %84 = tpu.concatenate %82, %83 in 1 : vector<16x1x4xf32>, vector<16x15x4xf32> -> vector<16x16x4xf32>
    %c14_i32_20 = arith.constant 14 : i32
    %85 = vector.broadcast %c14_i32_20 : i32 to vector<16x16x1xi32>
    %86 = arith.cmpi sle, %14, %85 : vector<16x16x1xi32>
    %c1_i32_21 = arith.constant 1 : i32
    %87 = vector.broadcast %c1_i32_21 : i32 to vector<16x16x1xi32>
    %88 = arith.cmpi sge, %15, %87 : vector<16x16x1xi32>
    %89 = arith.andi %86, %88 : vector<16x16x1xi1>
    %cst_22 = arith.constant 0.000000e+00 : f32
    %90 = vector.shape_cast %89 : vector<16x16x1xi1> to vector<16x16x1xi1>
    %91 = vector.broadcast %90 : vector<16x16x1xi1> to vector<16x16x4xi1>
    %92 = vector.broadcast %cst_22 : f32 to vector<16x16x4xf32>
    %93 = arith.select %91, %84, %92 : vector<16x16x4xi1>, vector<16x16x4xf32>
    %94 = arith.truncf %93 : vector<16x16x4xf32> to vector<16x16x4xbf16>
    %95 = vector.extract_strided_slice %13 {offsets = [1, 0, 0], sizes = [15, 16, 4], strides = [1, 1, 1]} : vector<16x16x4xf32> to vector<15x16x4xf32>
    %96 = vector.extract_strided_slice %13 {offsets = [0, 0, 0], sizes = [1, 16, 4], strides = [1, 1, 1]} : vector<16x16x4xf32> to vector<1x16x4xf32>
    %97 = tpu.concatenate %95, %96 in 0 : vector<15x16x4xf32>, vector<1x16x4xf32> -> vector<16x16x4xf32>
    %c14_i32_23 = arith.constant 14 : i32
    %98 = vector.broadcast %c14_i32_23 : i32 to vector<16x16x1xi32>
    %99 = arith.cmpi sle, %14, %98 : vector<16x16x1xi32>
    %cst_24 = arith.constant 0.000000e+00 : f32
    %100 = vector.shape_cast %99 : vector<16x16x1xi1> to vector<16x16x1xi1>
    %101 = vector.broadcast %100 : vector<16x16x1xi1> to vector<16x16x4xi1>
    %102 = vector.broadcast %cst_24 : f32 to vector<16x16x4xf32>
    %103 = arith.select %101, %97, %102 : vector<16x16x4xi1>, vector<16x16x4xf32>
    %104 = arith.truncf %103 : vector<16x16x4xf32> to vector<16x16x4xbf16>
    %105 = vector.extract_strided_slice %13 {offsets = [1, 0, 0], sizes = [15, 16, 4], strides = [1, 1, 1]} : vector<16x16x4xf32> to vector<15x16x4xf32>
    %106 = vector.extract_strided_slice %13 {offsets = [0, 0, 0], sizes = [1, 16, 4], strides = [1, 1, 1]} : vector<16x16x4xf32> to vector<1x16x4xf32>
    %107 = tpu.concatenate %105, %106 in 0 : vector<15x16x4xf32>, vector<1x16x4xf32> -> vector<16x16x4xf32>
    %108 = vector.extract_strided_slice %107 {offsets = [0, 1, 0], sizes = [16, 15, 4], strides = [1, 1, 1]} : vector<16x16x4xf32> to vector<16x15x4xf32>
    %109 = vector.extract_strided_slice %107 {offsets = [0, 0, 0], sizes = [16, 1, 4], strides = [1, 1, 1]} : vector<16x16x4xf32> to vector<16x1x4xf32>
    %110 = tpu.concatenate %108, %109 in 1 : vector<16x15x4xf32>, vector<16x1x4xf32> -> vector<16x16x4xf32>
    %c14_i32_25 = arith.constant 14 : i32
    %111 = vector.broadcast %c14_i32_25 : i32 to vector<16x16x1xi32>
    %112 = arith.cmpi sle, %14, %111 : vector<16x16x1xi32>
    %c14_i32_26 = arith.constant 14 : i32
    %113 = vector.broadcast %c14_i32_26 : i32 to vector<16x16x1xi32>
    %114 = arith.cmpi sle, %15, %113 : vector<16x16x1xi32>
    %115 = arith.andi %112, %114 : vector<16x16x1xi1>
    %cst_27 = arith.constant 0.000000e+00 : f32
    %116 = vector.shape_cast %115 : vector<16x16x1xi1> to vector<16x16x1xi1>
    %117 = vector.broadcast %116 : vector<16x16x1xi1> to vector<16x16x4xi1>
    %118 = vector.broadcast %cst_27 : f32 to vector<16x16x4xf32>
    %119 = arith.select %117, %110, %118 : vector<16x16x4xi1>, vector<16x16x4xf32>
    %120 = arith.truncf %119 : vector<16x16x4xf32> to vector<16x16x4xbf16>
    %121 = tpu.concatenate %31, %41, %57, %67, %68, %78, %94, %104, %120 in 2 : vector<16x16x4xbf16>, vector<16x16x4xbf16>, vector<16x16x4xbf16>, vector<16x16x4xbf16>, vector<16x16x4xbf16>, vector<16x16x4xbf16>, vector<16x16x4xbf16>, vector<16x16x4xbf16>, vector<16x16x4xbf16> -> vector<16x16x36xbf16>
    %122 = vector.shape_cast %121 : vector<16x16x36xbf16> to vector<256x36xbf16>
    %c0_28 = arith.constant 0 : index
    %c0_29 = arith.constant 0 : index
    %123 = vector.load %arg5[%c0_28, %c0_29] : memref<36x4xbf16, #tpu.memory_space<vmem>>, vector<36x4xbf16>
    %cst_30 = arith.constant dense<0.000000e+00> : vector<256x4xf32>
    %124 = tpu.matmul %122, %123, %cst_30 {dimension_numbers = #tpu.dot_dimension_numbers<[1], [0], [0], [1], [0, 0, 1, 1], [], []>} : vector<256x36xbf16>, vector<36x4xbf16>, vector<256x4xf32> -> vector<256x4xf32>
    %c0_31 = arith.constant 0 : index
    %c0_32 = arith.constant 0 : index
    %125 = vector.load %arg6[%c0_31, %c0_32] : memref<1x4xf32, #tpu.memory_space<vmem>>, vector<1x4xf32>
    %126 = vector.broadcast %125 : vector<1x4xf32> to vector<256x4xf32>
    %127 = arith.mulf %124, %126 : vector<256x4xf32>
    %c0_33 = arith.constant 0 : index
    %c0_34 = arith.constant 0 : index
    %128 = vector.load %arg7[%c0_33, %c0_34] : memref<1x4xf32, #tpu.memory_space<vmem>>, vector<1x4xf32>
    %129 = vector.broadcast %128 : vector<1x4xf32> to vector<256x4xf32>
    %130 = arith.addf %127, %129 : vector<256x4xf32>
    %cst_35 = arith.constant 0.000000e+00 : f32
    %131 = vector.broadcast %cst_35 : f32 to vector<256x4xf32>
    %132 = arith.maximumf %130, %131 : vector<256x4xf32>
    %133 = arith.truncf %132 : vector<256x4xf32> to vector<256x4xbf16>
    %c0_36 = arith.constant 0 : index
    %c0_37 = arith.constant 0 : index
    %134 = vector.load %arg8[%c0_36, %c0_37] : memref<4x16xbf16, #tpu.memory_space<vmem>>, vector<4x16xbf16>
    %cst_38 = arith.constant dense<0.000000e+00> : vector<256x16xf32>
    %135 = tpu.matmul %133, %134, %cst_38 {dimension_numbers = #tpu.dot_dimension_numbers<[1], [0], [0], [1], [0, 0, 1, 1], [], []>} : vector<256x4xbf16>, vector<4x16xbf16>, vector<256x16xf32> -> vector<256x16xf32>
    %c0_39 = arith.constant 0 : index
    %c0_40 = arith.constant 0 : index
    %136 = vector.load %arg9[%c0_39, %c0_40] : memref<1x16xf32, #tpu.memory_space<vmem>>, vector<1x16xf32>
    %137 = vector.broadcast %136 : vector<1x16xf32> to vector<256x16xf32>
    %138 = arith.mulf %135, %137 : vector<256x16xf32>
    %c0_41 = arith.constant 0 : index
    %c0_42 = arith.constant 0 : index
    %139 = vector.load %arg10[%c0_41, %c0_42] : memref<1x16xf32, #tpu.memory_space<vmem>>, vector<1x16xf32>
    %140 = vector.broadcast %139 : vector<1x16xf32> to vector<256x16xf32>
    %141 = arith.addf %138, %140 : vector<256x16xf32>
    %142 = arith.extf %2 : vector<256x16xbf16> to vector<256x16xf32>
    %143 = arith.addf %141, %142 : vector<256x16xf32>
    %cst_43 = arith.constant 0.000000e+00 : f32
    %144 = vector.broadcast %cst_43 : f32 to vector<256x16xf32>
    %145 = arith.maximumf %143, %144 : vector<256x16xf32>
    %146 = vector.shape_cast %145 : vector<256x16xf32> to vector<16x16x16xf32>
    %c0_44 = arith.constant 0 : index
    %c0_45 = arith.constant 0 : index
    %c0_46 = arith.constant 0 : index
    %c0_47 = arith.constant 0 : index
    %147 = vector.load %arg11[%c0_44, %c0_45, %c0_46, %c0_47] : memref<1x16x16x16xf32, #tpu.memory_space<vmem>>, vector<1x16x16x16xf32>
    %148 = vector.shape_cast %147 : vector<1x16x16x16xf32> to vector<16x16x16xf32>
    %149 = vector.shape_cast %146 : vector<16x16x16xf32> to vector<1x16x16x16xf32>
    tpu.vector_store %arg11[%c0_44, %c0_45, %c0_46, %c0_47], %149 {strides = array<i32>} : memref<1x16x16x16xf32, #tpu.memory_space<vmem>>, vector<1x16x16x16xf32>,
    return
  }
  func.func @transform_0(%arg0: i32) -> (i32, i32, i32, i32) {
    %c0_i32 = arith.constant 0 : i32
    %c0_i32_0 = arith.constant 0 : i32
    %c0_i32_1 = arith.constant 0 : i32
    %c0_i32_2 = arith.constant 0 : i32
    return %arg0, %c0_i32, %c0_i32_0, %c0_i32_1 : i32, i32, i32, i32
  }
  func.func @transform_1(%arg0: i32) -> (i32, i32) {
    %c0_i32 = arith.constant 0 : i32
    %c0_i32_0 = arith.constant 0 : i32
    %c0_i32_1 = arith.constant 0 : i32
    return %c0_i32, %c0_i32_0 : i32, i32
  }
  func.func @transform_2(%arg0: i32) -> (i32, i32) {
    %c0_i32 = arith.constant 0 : i32
    %c0_i32_0 = arith.constant 0 : i32
    %c0_i32_1 = arith.constant 0 : i32
    return %c0_i32, %c0_i32_0 : i32, i32
  }
  func.func @transform_3(%arg0: i32) -> (i32, i32) {
    %c0_i32 = arith.constant 0 : i32
    %c0_i32_0 = arith.constant 0 : i32
    %c0_i32_1 = arith.constant 0 : i32
    return %c0_i32, %c0_i32_0 : i32, i32
  }
  func.func @transform_4(%arg0: i32) -> (i32, i32) {
    %c0_i32 = arith.constant 0 : i32
    %c0_i32_0 = arith.constant 0 : i32
    %c0_i32_1 = arith.constant 0 : i32
    return %c0_i32, %c0_i32_0 : i32, i32
  }
  func.func @transform_5(%arg0: i32) -> (i32, i32) {
    %c0_i32 = arith.constant 0 : i32
    %c0_i32_0 = arith.constant 0 : i32
    %c0_i32_1 = arith.constant 0 : i32
    return %c0_i32, %c0_i32_0 : i32, i32
  }
  func.func @transform_6(%arg0: i32) -> (i32, i32) {
    %c0_i32 = arith.constant 0 : i32
    %c0_i32_0 = arith.constant 0 : i32
    %c0_i32_1 = arith.constant 0 : i32
    return %c0_i32, %c0_i32_0 : i32, i32
  }
  func.func @transform_7(%arg0: i32) -> (i32, i32) {
    %c0_i32 = arith.constant 0 : i32
    %c0_i32_0 = arith.constant 0 : i32
    %c0_i32_1 = arith.constant 0 : i32
    return %c0_i32, %c0_i32_0 : i32, i32
  }
  func.func @transform_8(%arg0: i32) -> (i32, i32) {
    %c0_i32 = arith.constant 0 : i32
    %c0_i32_0 = arith.constant 0 : i32
    %c0_i32_1 = arith.constant 0 : i32
    return %c0_i32, %c0_i32_0 : i32, i32
  }
  func.func @transform_9(%arg0: i32) -> (i32, i32) {
    %c0_i32 = arith.constant 0 : i32
    %c0_i32_0 = arith.constant 0 : i32
    %c0_i32_1 = arith.constant 0 : i32
    return %c0_i32, %c0_i32_0 : i32, i32
  }
  func.func @transform_10(%arg0: i32) -> (i32, i32, i32, i32) {
    %c0_i32 = arith.constant 0 : i32
    %c0_i32_0 = arith.constant 0 : i32
    %c0_i32_1 = arith.constant 0 : i32
    %c0_i32_2 = arith.constant 0 : i32
    return %arg0, %c0_i32, %c0_i32_0, %c0_i32_1 : i32, i32, i32, i32
  }
}

</mosaic_0001>

<bundles_post_ra>
// kernel: tpu_custom_call.1
= control target key start
LH: loop header
LB: loop body
LE: loop exit
PB: predicated region body
PF: predicated region fallthrough
CT: control target
= control target key end

     0   :  { %15 = vsyncpa [#allocation3], 0  ;;  %s4829_s0 = inlined_call_operand.hbm [shape: bf16[2,16,16,16], index: 0, kind: input, shape index: {}]   ;;  %s4830_s1 = inlined_call_operand.vmem [shape: bf16[16,4], index: 1, kind: input, shape index: {}]   ;;  %s4831_s2 = inlined_call_operand.vmem [shape: f32[1,4], index: 2, kind: input, shape index: {}]   ;;  %s4832_s3 = inlined_call_operand.vmem [shape: f32[1,4], index: 3, kind: input, shape index: {}]   ;;  %s4833_s4 = inlined_call_operand.vmem [shape: bf16[36,4], index: 4, kind: input, shape index: {}]   ;;  %s4834_s5 = inlined_call_operand.vmem [shape: f32[1,4], index: 5, kind: input, shape index: {}]   ;;  %s4835_s6 = inlined_call_operand.vmem [shape: f32[1,4], index: 6, kind: input, shape index: {}]   ;;  %s4836_s7 = inlined_call_operand.vmem [shape: bf16[4,16], index: 7, kind: input, shape index: {}]   ;;  %s4837_s8 = inlined_call_operand.vmem [shape: f32[1,16], index: 8, kind: input, shape index: {}]   ;;  %s4838_s9 = inlined_call_operand.vmem [shape: f32[1,16], index: 9, kind: input, shape index: {}]   ;;  %s4839_s10 = inlined_call_operand.hbm [shape: f32[2,16,16,16], index: 10, kind: output, shape index: {}]  }
   0x1   :  { %17 = vsyncpa [#allocation3 + $0x1], 0 }
   0x2   :  { %18 = vsyncpa [#allocation4], 0 }
   0x3   :  { %20 = vsyncpa [#allocation4 + $0x1], 0  ;;  %s3405_s13 = smov 0   ;;  %s3407_s14 = smov 0  }
   0x4   :  { %s3409_s15 = smov 0   ;;  %s3411_s16 = smov 0  }
   0x5 LB: > { %s3426_s17 = sadd.s32 4294967295, %s3334_s16   ;;  %s2875_s18 = sadd.s32 4294967294, %s3334_s16   ;;  %s3334_s16 = sphi %s3411_s16, %s4872_s16   ;;  %s3330_s15 = sphi %s3409_s15, %s4871_s15   ;;  %s3326_s14 = sphi %s3407_s14, %s4870_s14   ;;  %s3322_s13 = sphi %s3405_s13, %s4869_s13  }
   0x6   : > { %s3430_s19 = sadd.s32 1, %s3334_s16   ;;  %s33_s20 = sadd.s32 1, %s3330_s15 }
   0x7   : > { %s30_s21 = ssub.s32 %s3334_s16, %s3430_s19  ;;  %p40_p0 = scmp.ne.s32.totalorder %s3330_s15, %s3326_s14 }
   0x8   : > { %p31_p1 = scmp.eq.s32.totalorder %s30_s21, 0  ;;  %p41_p2 = scmp.eq.s32.totalorder %s3334_s16, 0 }
   0x9   : > { %p46_p3 = scmp.ne.s32.totalorder %s3326_s14, %s3322_s13  ;;  %p47_p4 = scmp.eq.s32.totalorder %s3426_s17, 0 }
   0xa   : > { %s3442_s22 = scalar_select %p31_p1, %s3330_s15, %s33_s20  }
   0xb   : > { %p3444_p5 = por %p41_p2, %p40_p0  ;;  %p3448_p6 = por %p47_p4, %p46_p3 }
   0xc   : > { %4848 = sst [smem:[#allocation8_spill]] %s3442_s22  ;;  %p259_p7 = scmp.eq.s32.totalorder %s3426_s17, 1 }
   0xd   : > { %p265_p8 = scmp.eq.s32.totalorder %s2875_s18, 1  ;;  %p3140_p10 = scmp.lt.s32.totalorder %s3334_s16, 2 }
   0xe   : > { %p3455_p11 = por %p259_p7, %p40_p0  ;;  %s312_s27 = sand.u32 1, %s3330_s15  }
   0xf   : > { %p3459_p12 = por %p265_p8, %p46_p3  ;;  %s2963_s28 = sshll.u32 %s3334_s16, 11 }
  0x10   : > { %s4851_s25 = scalar_select %p3455_p11, 1, 0 }
  0x11   : > { %s4852_s26 = scalar_select %p3459_p12, 1, 0 }
  0x12   : > { %s2878_s29 = sshll.u32 %s312_s27, 7  ;;  %s3468_s12 = scalar_lea.hbm %s4829_s0, %s2963_s28 }
  0x13   : > { %s316_s18 = scalar_lea.vmem [#allocation2], %s2878_s29  ;;  %p3472_p13 = pnand %p3140_p10, %p3444_p5 }
  0x14   : > { %s323_s20 = sshll.u32 %s316_s18, 4  ;;  %s3478_s22 = scalar_lea.sflag [#allocation3], %s312_s27  ;;  %s3476_s20 = int_to_ptr.vmem [resolvable:$true] %s323_s20 }
  0x15   : > { %s3238_s30 = scalar_lea.hbm %s3468_s12, 2048  ;;  %p3240_p1 = pneg %p3472_p13 }
  0x16   : > { %p3239_p0 = scmp.ne.s32.totalorder %s3468_s12, %s3238_s30  ;;  %s3243_s29 = scalar_lea.hbm %s4829_s0, 4096 }
  0x17   : > { %p3244_p4 = scmp.lt.u32.totalorder %s3468_s12, %s4829_s0  ;;  %p3245_p5 = scmp.lt.u32.totalorder %s3243_s29, %s3238_s30 }
  0x18   : > { %p3241_p2 = pnand %p3240_p1, %p3239_p0  ;;  %p3247_p8 = scmp.lt.u32.totalorder %s3238_s30, %s3468_s12 }
  0x19   : > { %p3246_p7 = por %p3245_p5, %p3244_p4 }
  0x1a   : > { %p3242_p3 = pneg %p3241_p2 }
  0x1b   : > { %p3248_p10 = por %p3247_p8, %p3246_p7 }
  0x1d   : > { %p3249_p9 = pnand %p3248_p10, %p3242_p3 }
  0x1f   : > { %3252 = shalt.err (!%p3249_p9)
}
  0x20   : > { %s3253_s27 = scalar_lea.vmem %s3476_s20, 2048  ;;  %s3336_s28 = smov [#allocation2]  }
  0x21   : > { %p3254_p0 = scmp.ne.s32.totalorder %s3476_s20, %s3253_s27  ;;  %s3258_s23 = sshll.u32 %s3336_s28, 4  ;;  %s3259_s23 = int_to_ptr.vmem [resolvable:$false] %s3258_s23 }
  0x22   : > { %s3260_s11 = scalar_lea.vmem %s3259_s23, 4096  ;;  %p3261_p11 = scmp.lt.s32.totalorder %s3476_s20, %s3259_s23 }
  0x23   : > { %p3256_p2 = pnand %p3254_p0, %p3240_p1  ;;  %p3262_p4 = scmp.lt.s32.totalorder %s3260_s11, %s3253_s27 }
  0x25   : > { %p3257_p12 = pneg %p3256_p2  ;;  %p3263_p5 = por %p3262_p4, %p3261_p11 }
  0x27   : > { %p3264_p7 = pnand %p3263_p5, %p3257_p12 }
  0x29   : > { %3267 = shalt.err (!%p3264_p7)
}
  0x2a   : > { %s3337_s30 = smov 64   ;;  %s3338_s29 = smov 4  }
  0x2b   : > { %3135 = dma.hbm_to_vmem [thread:$0]  (!%p3472_p13), %s3468_s12, 2048, %s3476_s20, %s3478_s22, %s3337_s30, %s3337_s30, %s3338_s29  }
  0x2c   : > { %p2881_p9 = scmp.ge.s32.totalorder %s3334_s16, 1  ;;  %p331_p1 = scmp.lt.s32.totalorder %s3334_s16, 3 }
  0x2e   : > { %p332_p3 = pnand %p2881_p9, %p331_p1 }
  0x30   : > { %335 = sbr.rel (%p332_p3) target bundleno = 1116 (0x45c), region = 60 }
  0x37   : > { %s3509_s18 = sand.u32 1, %s3326_s14  }
  0x38   : > { %s2882_s27 = sshll.u32 %s3509_s18, 7  ;;  %s338_s28 = scalar_lea.sflag [#allocation3], %s3509_s18 }
  0x39   : > { %s3513_s23 = scalar_lea.vmem [#allocation2], %s2882_s27 }
  0x3a   : > { %3313 = dma.done.wait (%p3448_p6), %s338_s28, 2048  }
  0x3b   : > { %3315 = vsyncadd (%p3448_p6), %s338_s28, 4294965248  ;;  %v3186_v0 = vld [vmem:[%s4830_s1] sm:$0xff]   ;;  %vm499_vm0 = vcmask 130048   ;;  %v381_v3 = vld [vmem:[%s3513_s23 + $0x8] sm:$0xff]   ;;  %v4845_v17 = vmov 0.0|0.0   ;;  %s3340_s24 = smov 8   ;;  %v819_v18 = vlaneseq }
  0x3c   : > { %v379_v1 = vld [vmem:[%s3513_s23] sm:$0xff]   ;;  %3018 = vmatprep.subr.bf16.mxu0 %v3186_v0  ;;  %3124 = vmatprep.subr.bf16.mxu1 %v3186_v0  ;;  %v397_v4 = vld [vmem:[%s3513_s23 + $0x48] sm:$0xff]   ;;  %v383_v5 = vld [vmem:[%s3513_s23 + $0x10] sm:$0xff]   ;;  %s3341_s20 = smov 4   ;;  %vm886_vm1 = vcmask 1040384   ;;  %vm1077_vm2 = vcmask 1046528  }
  0x3d   : > { %v395_v2 = vld [vmem:[%s3513_s23 + $0x40] sm:$0xff]   ;;  %3019 = vmatpush3.bf16.msra.mxu0 %v3186_v0  ;;  %3125 = vmatpush3.bf16.msra.mxu1 %v3186_v0  ;;  %v399_v6 = vld [vmem:[%s3513_s23 + $0x50] sm:$0xff]   ;;  %v385_v7 = vld [vmem:[%s3513_s23 + $0x18] sm:$0xff]   ;;  %v3563_v20 = vshrl.u32 %v819_v18, 7  ;;  %s4841_s27 = smov 28   ;;  %s4843_s28 = smov 16  }
  0x3e   : > { %3020 = vmatprep.mubr.msk.bf16.mxu0 %vm499_vm0, %v379_v1  ;;  %3036 = vmatprep.mubr.msk.bf16.mxu1 %vm499_vm0, %v395_v2  ;;  %v401_v8 = vld [vmem:[%s3513_s23 + $0x58] sm:$0xff]   ;;  %v387_v9 = vld [vmem:[%s3513_s23 + $0x20] sm:$0xff]   ;;  %v389_v11 = vld [vmem:[%s3513_s23 + $0x28] sm:$0xff]   ;;  %s3344_s22 = smov 24   ;;  %s3345_s12 = smov 12   ;;  %vm2078_vm5 = vcmask 1041408  }
  0x3f   : > { %v403_v10 = vld [vmem:[%s3513_s23 + $0x60] sm:$0xff]   ;;  %v405_v12 = vld [vmem:[%s3513_s23 + $0x68] sm:$0xff]   ;;  %v391_v13 = vld [vmem:[%s3513_s23 + $0x30] sm:$0xff]   ;;  %1454 = vrot.lane.b32.xlu1 %v4845_v17, %s3340_s24  ;;  %v3575_v32 = vadd.s32 8, %v3563_v20  ;;  %vm967_vm3 = vcmp.ge.s32.totalorder %v3563_v20, 1  ;;  %s3346_s21 = smov 32  }
  0x40   : > { %3021 = vmatmul.mubr.msk.bf16.vlgmr.msra.gmra.mrb[0].mxu0 %vm499_vm0, %v381_v3  ;;  %3037 = vmatmul.mubr.msk.bf16.vlgmr.msra.gmra.mrb[0].mxu1 %vm499_vm0, %v397_v4  ;;  %v407_v14 = vld [vmem:[%s3513_s23 + $0x70] sm:$0xff]   ;;  %v393_v15 = vld [vmem:[%s3513_s23 + $0x38] sm:$0xff]   ;;  %v3561_v19 = vld [vmem:[%s4831_s2] ss:$0 sm:$0xff]  ;;  %s3347_s11 = smov 20   ;;  %vm1746_vm6 = vcmask 31744  }
  0x41   : > { %3024 = vmatprep.mubr.msk.bf16.mxu0 %vm499_vm0, %v383_v5  ;;  %3040 = vmatprep.mubr.msk.bf16.mxu1 %vm499_vm0, %v399_v6  ;;  %v409_v16 = vld [vmem:[%s3513_s23 + $0x78] sm:$0xff]   ;;  %v3568_v22 = vld [vmem:[%s4832_s3] ss:$0 sm:$0xff]  ;;  %vm1191_vm4 = vcmp.le.s32.totalorder %v3575_v32, 14  ;;  %vm1795_vm7 = vcmask 64512   ;;  %vm1828_vm8 = vcmask 97280  }
  0x42   : > { %1406 = vrot.lane.b32.xlu0 %v4845_v17, %s3341_s20  ;;  %v3203_v32 = vld [vmem:[%s4833_s4] sm:$0xff]   ;;  %v3205_v20 = vld [vmem:[%s4833_s4 + $0x10] ss:$0 sps:$4 sm:$0x33]   ;;  %vm1926_vm9 = vcmask 195584   ;;  %vm1893_vm10 = vcmask 162816  }
  0x43   : > { %3052 = vmatprep.subr.bf16.mxu1 %v3203_v32  ;;  %vm1959_vm11 = vcmask 228352   ;;  %vm1992_vm12 = vcmask 261120   ;;  %vm2045_vm13 = vcmask 293888   ;;  %p4865_p11 = scmp.ne.s32.totalorder %s4851_s25, 0 }
  0x44   : > { %3053 = vmatpush3.bf16.msra.mxu1 %v3203_v32 }
  0x48   : > { %3025 = vmatmul.mubr.msk.bf16.gmra.mrb[4].mxu0 %vm499_vm0, %v385_v7  ;;  %3041 = vmatmul.mubr.msk.bf16.gmra.mrb[4].mxu1 %vm499_vm0, %v401_v8 }
  0x49   : > { %3028 = vmatprep.mubr.msk.bf16.mxu0 %vm499_vm0, %v387_v9  ;;  %3044 = vmatprep.mubr.msk.bf16.mxu1 %vm499_vm0, %v403_v10 }
  0x50   : > { %3029 = vmatmul.mubr.msk.bf16.gmra.mrb[8].mxu0 %vm499_vm0, %v389_v11  ;;  %3045 = vmatmul.mubr.msk.bf16.gmra.mrb[8].mxu1 %vm499_vm0, %v405_v12 }
  0x51   : > { %3032 = vmatprep.mubr.msk.bf16.mxu0 %vm499_vm0, %v391_v13  ;;  %3048 = vmatprep.mubr.msk.bf16.mxu1 %vm499_vm0, %v407_v14 }
  0x58   : > { %3033 = vmatmul.mubr.msk.bf16.gmra.mrb[12].mxu0 %vm499_vm0, %v393_v15  ;;  %3049 = vmatmul.mubr.msk.bf16.gmra.mrb[12].mxu1 %vm499_vm0, %v409_v16 }
 0x113   : > { %v3022_v21 = vpop.f32.mrb[0].mxu0  ;;  %v3038_v23 = vpop.f32.mrb[0].mxu1 }
 0x114   : > { %v718_v24 = vmul.f32 %v3022_v21, %v3561_v19  ;;  %v734_v25 = vmul.f32 %v3038_v23, %v3561_v19  ;;  %v582_v26 = vpop.f32.mrb[1].mxu0  ;;  %v646_v27 = vpop.f32.mrb[1].mxu1 }
 0x115   : > { %v716_v28 = vmul.f32 %v3561_v19, %v582_v26  ;;  %v732_v29 = vmul.f32 %v3561_v19, %v646_v27  ;;  %v3023_v30 = vpop.f32.mrb[2].mxu0  ;;  %v3039_v31 = vpop.f32.mrb[2].mxu1 }
 0x116   : > { %v757_v33 = vadd.f32 %v3568_v22, %v718_v24  ;;  %v773_v34 = vadd.f32 %v3568_v22, %v734_v25  ;;  %v719_v35 = vmul.f32 %v3023_v30, %v3561_v19  ;;  %v735_v36 = vmul.f32 %v3039_v31, %v3561_v19  ;;  %v585_v37 = vpop.f32.mrb[3].mxu0  ;;  %v649_v38 = vpop.f32.mrb[3].mxu1 }
 0x117   : > { %v755_v39 = vadd.f32 %v3568_v22, %v716_v28  ;;  %v771_v40 = vadd.f32 %v3568_v22, %v732_v29  ;;  %v717_v41 = vmul.f32 %v3561_v19, %v585_v37  ;;  %v733_v42 = vmul.f32 %v3561_v19, %v649_v38 }
 0x118   : > { %v789_v43 = vmax.f32 %v757_v33, 0.0  ;;  %v3585_v44 = vmax.f32 %v773_v34, 0.0  ;;  %v758_v45 = vadd.f32 %v3568_v22, %v719_v35  ;;  %v774_v46 = vadd.f32 %v3568_v22, %v735_v36 }
 0x119   : > { %v3589_v47 = vmax.f32 %v755_v39, 0.0  ;;  %v3591_v48 = vmax.f32 %v771_v40, 0.0  ;;  %v756_v49 = vadd.f32 %v3568_v22, %v717_v41  ;;  %v772_v50 = vadd.f32 %v3568_v22, %v733_v42 }
 0x11a   : > { %v891_v51 = vrot.slane %v789_v43, 7  ;;  %v1084_v52 = vrot.slane %v789_v43, 1  ;;  %v907_v53 = vrot.slane %v3585_v44, 7  ;;  %v1108_v54 = vrot.slane %v3585_v44, 1 }
 0x11b   : > { %v889_v55 = vrot.slane %v3589_v47, 7  ;;  %v1081_v56 = vrot.slane %v3589_v47, 1  ;;  %v3026_v57 = vpop.f32.mrb[4].mxu0  ;;  %v3042_v58 = vpop.f32.mrb[4].mxu1  ;;  %v790_v59 = vmax.f32 %v758_v45, 0.0  ;;  %v806_v60 = vmax.f32 %v774_v46, 0.0 }
 0x11c   : > { %v3601_v61 = vmax.f32 %v756_v49, 0.0  ;;  %v3603_v62 = vmax.f32 %v772_v50, 0.0  ;;  %v598_v63 = vpop.f32.mrb[5].mxu0  ;;  %v662_v0 = vpop.f32.mrb[5].mxu1  ;;  %v905_v1 = vrot.slane %v3591_v48, 7  ;;  %v722_v2 = vmul.f32 %v3026_v57, %v3561_v19 }
 0x11d   : > { %v720_v3 = vmul.f32 %v3561_v19, %v598_v63  ;;  %v3027_v4 = vpop.f32.mrb[6].mxu0  ;;  %v3609_v5 = vmul.f32 %v3042_v58, %v3561_v19  ;;  %v3611_v6 = vpop.f32.mrb[6].mxu1  ;;  %v840_v7 = vrot.slane %v790_v59, 7  ;;  %v1085_v8 = vrot.slane %v790_v59, 1 }
 0x11e   : > { %v848_v9 = vrot.slane %v806_v60, 7  ;;  %v601_v10 = vpop.f32.mrb[7].mxu0  ;;  %v3614_v11 = vmul.f32 %v3561_v19, %v662_v0  ;;  %v3616_v12 = vpop.f32.mrb[7].mxu1  ;;  %v1109_v13 = vrot.slane %v806_v60, 1  ;;  %v839_v14 = vrot.slane %v3601_v61, 7 }
 0x11f   : > { %v1082_v15 = vrot.slane %v3601_v61, 1  ;;  %v847_v16 = vrot.slane %v3603_v62, 7  ;;  %v1063_v18 = vpack.c.bf16 %v790_v59, %v789_v43  ;;  %v3622_v21 = vpack.c.bf16 %v806_v60, %v3585_v44 }
 0x120   : > { %v3626_v23 = vpack.c.bf16 %v3601_v61, %v3589_v47  ;;  %v3630_v24 = vpack.c.bf16 %v3603_v62, %v3591_v48  ;;  %v892_v25 = vsel %vm886_vm1, %v891_v51, %v840_v7  ;;  %v953_v26 = vsel %vm886_vm1, %v840_v7, %v891_v51 }
 0x121   : > { %v1086_v27 = vsel %vm1077_vm2, %v1084_v52, %v1085_v8  ;;  %v1176_v28 = vsel %vm1077_vm2, %v1085_v8, %v1084_v52  ;;  %1680 = vrot.lane.b32.xlu0 %v1063_v18, %s4841_s27  ;;  %1552 = vrot.lane.b32.xlu1 %v1063_v18, %s4843_s28  ;;  %v985_v29 = vsel %vm967_vm3, %v953_v26, 0.0  ;;  %v908_v31 = vsel %vm886_vm1, %v907_v53, %v848_v9 }
 0x122   : > { %v1209_v30 = vsel %vm1191_vm4, %v1176_v28, 0.0  ;;  %v961_v33 = vsel %vm886_vm1, %v848_v9, %v907_v53  ;;  %v3644_v34 = vpack.c.bf16 %v892_v25, %v985_v29  ;;  %v1110_v37 = vsel %vm1077_vm2, %v1108_v54, %v1109_v13 }
 0x123   : > { %v3646_v35 = vpack.c.bf16 %v1209_v30, %v1086_v27  ;;  %v1001_v36 = vsel %vm967_vm3, %v961_v33, 0.0  ;;  %v3651_v38 = vpop.f32.mrb[8].mxu0  ;;  %v3653_v39 = vpop.f32.mrb[8].mxu1  ;;  %v1184_v41 = vsel %vm1077_vm2, %v1109_v13, %v1108_v54  ;;  %v761_v42 = vadd.f32 %v3568_v22, %v722_v2 }
 0x124   : > { %v3655_v40 = vpack.c.bf16 %v908_v31, %v1001_v36  ;;  %v759_v43 = vadd.f32 %v3568_v22, %v720_v3  ;;  %v3660_v44 = vpop.f32.mrb[9].mxu0  ;;  %v3662_v45 = vpop.f32.mrb[9].mxu1  ;;  %v1225_v46 = vsel %vm1191_vm4, %v1184_v41, 0.0  ;;  %v1083_v49 = vsel %vm1077_vm2, %v1081_v56, %v1082_v15 }
 0x125   : > { %v1175_v50 = vsel %vm1077_vm2, %v1082_v15, %v1081_v56  ;;  %v723_v51 = vmul.f32 %v3027_v4, %v3561_v19  ;;  %v3669_v52 = vpop.f32.mrb[10].mxu0  ;;  %v3671_v53 = vpop.f32.mrb[10].mxu1  ;;  %1696 = vrot.lane.b32.xlu0 %v3622_v21, %s4841_s27  ;;  %1410 = vrot.lane.b32.xlu1 %v1063_v18, %s3341_s20  ;;  %v3676_v54 = vpack.c.bf16 %v1225_v46, %v1110_v37  ;;  %v793_v57 = vmax.f32 %v761_v42, 0.0 }
 0x126   : > { %v3678_v58 = vmax.f32 %v759_v43, 0.0  ;;  %v1207_v59 = vsel %vm1191_vm4, %v1175_v50, 0.0  ;;  %v3682_v56 = vpop.f32.mrb[11].mxu0  ;;  %v3684_v60 = vpop.f32.mrb[11].mxu1  ;;  %v721_v0 = vmul.f32 %v3561_v19, %v601_v10  ;;  %v906_v2 = vsel %vm886_vm1, %v905_v1, %v847_v16 }
 0x127   : > { %v3686_v61 = vpack.c.bf16 %v1207_v59, %v1083_v49  ;;  %v762_v63 = vadd.f32 %v3568_v22, %v723_v51  ;;  %v1105_v3 = vrot.slane %v3591_v48, 1  ;;  %v1106_v4 = vrot.slane %v3603_v62, 1 }
 0x128   : > { %v895_v7 = vrot.slane %v793_v57, 7  ;;  %v760_v9 = vadd.f32 %v3568_v22, %v721_v0  ;;  %v960_v13 = vsel %vm886_vm1, %v847_v16, %v905_v1  ;;  %v890_v10 = vsel %vm886_vm1, %v889_v55, %v839_v14 }
 0x129   : > { %v794_v8 = vmax.f32 %v762_v63, 0.0  ;;  %1568 = vrot.lane.b32.xlu1 %v3622_v21, %s4843_s28  ;;  %1408 = vrot.lane.b32.xlu0 %v3626_v23, %s3341_s20  ;;  %v999_v62 = vsel %vm967_vm3, %v960_v13, 0.0  ;;  %v952_v15 = vsel %vm886_vm1, %v839_v14, %v889_v55  ;;  %v777_v48 = vadd.f32 %v3568_v22, %v3609_v5 }
 0x12a   : > { %v775_v1 = vadd.f32 %v3568_v22, %v3614_v11  ;;  %v1090_v16 = vrot.slane %v793_v57, 1  ;;  %v893_v18 = vrot.slane %v3678_v58, 7  ;;  %v3716_v25 = vmax.f32 %v760_v9, 0.0 }
 0x12b   : > { %v3718_v26 = vpack.c.bf16 %v906_v2, %v999_v62  ;;  %v842_v27 = vrot.slane %v794_v8, 7  ;;  %v983_v28 = vsel %vm967_vm3, %v952_v15, 0.0  ;;  %v809_v47 = vmax.f32 %v777_v48, 0.0 }
 0x12c   : > { %v739_v55 = vmul.f32 %v3611_v6, %v3561_v19  ;;  %v1087_v5 = vrot.slane %v3678_v58, 1  ;;  %v1091_v14 = vrot.slane %v794_v8, 1  ;;  %v3725_v29 = vpack.c.bf16 %v890_v10, %v983_v28 }
 0x12d   : > { %v1107_v11 = vsel %vm1077_vm2, %v1105_v3, %v1106_v4  ;;  %1426 = vrot.lane.b32.xlu1 %v3622_v21, %s3341_s20  ;;  %1550 = vrot.lane.b32.xlu0 %v3626_v23, %s4843_s28  ;;  %v841_v30 = vrot.slane %v3716_v25, 7  ;;  %v1088_v31 = vrot.slane %v3716_v25, 1  ;;  %v911_v33 = vrot.slane %v809_v47, 7 }
 0x12e   : > { %v3734_v36 = vmax.f32 %v775_v1, 0.0  ;;  %v778_v6 = vadd.f32 %v3568_v22, %v739_v55  ;;  %v1183_v37 = vsel %vm1077_vm2, %v1106_v4, %v1105_v3  ;;  %v737_v41 = vmul.f32 %v3561_v19, %v3616_v12 }
 0x12f   : > { %v3740_v42 = vpack.c.bf16 %v794_v8, %v793_v57  ;;  %v1223_v21 = vsel %vm1191_vm4, %v1183_v37, 0.0  ;;  %v3746_v23 = vpack.c.bf16 %v3716_v25, %v3678_v58  ;;  %v896_v43 = vsel %vm886_vm1, %v895_v7, %v842_v27 }
 0x130   : > { %v955_v46 = vsel %vm886_vm1, %v842_v27, %v895_v7  ;;  %v810_v49 = vmax.f32 %v778_v6, 0.0  ;;  %v3750_v50 = vpack.c.bf16 %v1223_v21, %v1107_v11  ;;  %v776_v51 = vadd.f32 %v3568_v22, %v737_v41 }
 0x131   : > { %v989_v12 = vsel %vm967_vm3, %v955_v46, 0.0  ;;  %1694 = vrot.lane.b32.xlu1 %v3630_v24, %s4841_s27  ;;  %1566 = vrot.lane.b32.xlu0 %v3630_v24, %s4843_s28  ;;  %v1114_v57 = vrot.slane %v809_v47, 1  ;;  %v1092_v59 = vsel %vm1077_vm2, %v1090_v16, %v1091_v14  ;;  %v1178_v63 = vsel %vm1077_vm2, %v1091_v14, %v1090_v16 }
 0x132   : > { %v3759_v58 = vpack.c.bf16 %v896_v43, %v989_v12  ;;  %v850_v0 = vrot.slane %v810_v49, 7  ;;  %v1115_v2 = vrot.slane %v810_v49, 1  ;;  %v3763_v3 = vmax.f32 %v776_v51, 0.0 }
 0x133   : > { %v3765_v4 = vpack.c.bf16 %v810_v49, %v809_v47  ;;  %v1213_v7 = vsel %vm1191_vm4, %v1178_v63, 0.0  ;;  %v894_v8 = vsel %vm886_vm1, %v893_v18, %v841_v30  ;;  %v954_v9 = vsel %vm886_vm1, %v841_v30, %v893_v18 }
 0x134   : > { %v726_v13 = vmul.f32 %v3651_v38, %v3561_v19  ;;  %v909_v10 = vrot.slane %v3734_v36, 7  ;;  %v849_v62 = vrot.slane %v3763_v3, 7  ;;  %v3777_v15 = vpack.c.bf16 %v3763_v3, %v3734_v36 }
 0x135   : > { %v3779_v48 = vpack.c.bf16 %v1213_v7, %v1092_v59  ;;  %1424 = vrot.lane.b32.xlu1 %v3630_v24, %s3341_s20  ;;  %1646 = vrot.lane.b32.xlu0 %v3644_v34, %s3344_s22  ;;  %v912_v1 = vsel %vm886_vm1, %v911_v33, %v850_v0  ;;  %v963_v38 = vsel %vm886_vm1, %v850_v0, %v911_v33  ;;  %v987_v18 = vsel %vm967_vm3, %v954_v9, 0.0 }
 0x136   : > { %v1116_v16 = vsel %vm1077_vm2, %v1114_v57, %v1115_v2  ;;  %v1005_v25 = vsel %vm967_vm3, %v963_v38, 0.0  ;;  %v1186_v27 = vsel %vm1077_vm2, %v1115_v2, %v1114_v57  ;;  %v3793_v28 = vpack.c.bf16 %v894_v8, %v987_v18 }
 0x137   : > { %v765_v24 = vadd.f32 %v3568_v22, %v726_v13  ;;  %v3796_v47 = vpack.c.bf16 %v912_v1, %v1005_v25  ;;  %v1229_v55 = vsel %vm1191_vm4, %v1186_v27, 0.0  ;;  %v724_v14 = vmul.f32 %v3561_v19, %v3660_v44 }
 0x138   : > { %v1089_v11 = vsel %vm1077_vm2, %v1087_v5, %v1088_v31  ;;  %v3803_v30 = vpack.c.bf16 %v1229_v55, %v1116_v16  ;;  %v1177_v6 = vsel %vm1077_vm2, %v1088_v31, %v1087_v5  ;;  %v727_v37 = vmul.f32 %v3669_v52, %v3561_v19 }
 0x139   : > { %v3805_v33 = vmax.f32 %v765_v24, 0.0  ;;  %1504 = vrot.lane.b32.xlu1 %v3644_v34, %s3345_s12  ;;  %1714 = vrot.lane.b32.xlu0 %v3646_v35, %s3346_s21  ;;  %v763_v44 = vadd.f32 %v3568_v22, %v724_v14  ;;  %v1211_v41 = vsel %vm1191_vm4, %v1177_v6, 0.0  ;;  %v725_v21 = vmul.f32 %v3561_v19, %v3682_v56 }
 0x13a   : > { %v910_v5 = vsel %vm886_vm1, %v909_v10, %v849_v62  ;;  %v1111_v52 = vrot.slane %v3734_v36, 1  ;;  %v1112_v31 = vrot.slane %v3763_v3, 1  ;;  %v3822_v43 = vpack.c.bf16 %v1211_v41, %v1089_v11 }
 0x13b   : > { %v766_v46 = vadd.f32 %v3568_v22, %v727_v37  ;;  %v3825_v49 = vmax.f32 %v763_v44, 0.0  ;;  %v764_v51 = vadd.f32 %v3568_v22, %v725_v21  ;;  %v962_v12 = vsel %vm886_vm1, %v849_v62, %v909_v10 }
 0x13c   : > { %v742_v57 = vmul.f32 %v3653_v39, %v3561_v19  ;;  %v1003_v59 = vsel %vm967_vm3, %v962_v12, 0.0  ;;  %v740_v36 = vmul.f32 %v3561_v19, %v3662_v45  ;;  %v743_v63 = vmul.f32 %v3671_v53, %v3561_v19 }
 0x13d   : > { %v798_v56 = vmax.f32 %v766_v46, 0.0  ;;  %1600 = vrot.lane.b32.xlu1 %v3646_v35, %s3347_s11  ;;  %1458 = vrot.lane.b32.xlu0 %v3646_v35, %s3340_s24  ;;  %v899_v0 = vrot.slane %v3805_v33, 7  ;;  %v3842_v39 = vmax.f32 %v764_v51, 0.0  ;;  %v3844_v2 = vpack.c.bf16 %v910_v5, %v1003_v59  ;;  %v3034_v51 = vpop.f32.mrb[12].mxu0 }
 0x13e   : > { %v1096_v3 = vrot.slane %v3805_v33, 1  ;;  %v897_v45 = vrot.slane %v3825_v49, 7  ;;  %v781_v7 = vadd.f32 %v3568_v22, %v742_v57  ;;  %v779_v53 = vadd.f32 %v3568_v22, %v740_v36  ;;  %v630_v36 = vpop.f32.mrb[13].mxu0 }
 0x13f   : > { %v1093_v8 = vrot.slane %v3825_v49, 1  ;;  %v844_v9 = vrot.slane %v798_v56, 7  ;;  %v782_v13 = vadd.f32 %v3568_v22, %v743_v63  ;;  %v1113_v35 = vsel %vm1077_vm2, %v1111_v52, %v1112_v31 }
 0x140   : > { %v1097_v10 = vrot.slane %v798_v56, 1  ;;  %v813_v62 = vmax.f32 %v781_v7, 0.0  ;;  %v1185_v1 = vsel %vm1077_vm2, %v1112_v31, %v1111_v52  ;;  %v741_v38 = vmul.f32 %v3561_v19, %v3684_v60 }
 0x141   : > { %1520 = vrot.lane.b32.xlu1 %v3655_v40, %s3345_s12  ;;  %1662 = vrot.lane.b32.xlu0 %v3655_v40, %s3344_s22  ;;  %v814_v16 = vmax.f32 %v782_v13, 0.0  ;;  %v1227_v18 = vsel %vm1191_vm4, %v1185_v1, 0.0  ;;  %v3863_v25 = vpack.c.bf16 %v798_v56, %v3805_v33  ;;  %v3867_v27 = vpack.c.bf16 %v3842_v39, %v3825_v49 }
 0x142   : > { %v1094_v24 = vrot.slane %v3842_v39, 1  ;;  %v915_v60 = vrot.slane %v813_v62, 7  ;;  %v1120_v55 = vrot.slane %v813_v62, 1  ;;  %v811_v14 = vmax.f32 %v779_v53, 0.0  ;;  %v3035_v53 = vpop.f32.mrb[14].mxu0 }
 0x143   : > { %v852_v11 = vrot.slane %v814_v16, 7  ;;  %v1121_v6 = vrot.slane %v814_v16, 1  ;;  %v3870_v37 = vpack.c.bf16 %v1227_v18, %v1113_v35  ;;  %v780_v44 = vadd.f32 %v3568_v22, %v741_v38  ;;  %v633_v35 = vpop.f32.mrb[15].mxu0 }
 0x144   : > { %v3873_v41 = vpack.c.bf16 %v814_v16, %v813_v62  ;;  %v900_v33 = vsel %vm886_vm1, %v899_v0, %v844_v9  ;;  %v957_v21 = vsel %vm886_vm1, %v844_v9, %v899_v0  ;;  %v1098_v5 = vsel %vm1077_vm2, %v1096_v3, %v1097_v10 }
 0x145   : > { %1616 = vrot.lane.b32.xlu1 %v3676_v54, %s3347_s11  ;;  %1730 = vrot.lane.b32.xlu0 %v3676_v54, %s3346_s21  ;;  %v812_v52 = vmax.f32 %v780_v44, 0.0  ;;  %v993_v31 = vsel %vm967_vm3, %v957_v21, 0.0  ;;  %v1180_v46 = vsel %vm1077_vm2, %v1097_v10, %v1096_v3  ;;  %v916_v49 = vsel %vm886_vm1, %v915_v60, %v852_v11 }
 0x146   : > { %v843_v12 = vrot.slane %v3842_v39, 7  ;;  %v3887_v57 = vpack.c.bf16 %v900_v33, %v993_v31  ;;  %v1217_v56 = vsel %vm1191_vm4, %v1180_v46, 0.0  ;;  %v965_v59 = vsel %vm886_vm1, %v852_v11, %v915_v60 }
 0x147   : > { %v913_v63 = vrot.slane %v811_v14, 7  ;;  %v3892_v0 = vpack.c.bf16 %v812_v52, %v811_v14  ;;  %v3894_v7 = vpack.c.bf16 %v1217_v56, %v1098_v5  ;;  %v851_v3 = vrot.slane %v812_v52, 7 }
 0x148   : > { %v1009_v9 = vsel %vm967_vm3, %v965_v59, 0.0  ;;  %v1122_v39 = vsel %vm1077_vm2, %v1120_v55, %v1121_v6  ;;  %v1188_v13 = vsel %vm1077_vm2, %v1121_v6, %v1120_v55  ;;  %v1095_v1 = vsel %vm1077_vm2, %v1093_v8, %v1094_v24 }
 0x149   : > { %1456 = vrot.lane.b32.xlu1 %v3686_v61, %s3340_s24  ;;  %1474 = vrot.lane.b32.xlu0 %v3676_v54, %s3340_s24  ;;  %v3904_v10 = vpack.c.bf16 %v916_v49, %v1009_v9  ;;  %v1233_v62 = vsel %vm1191_vm4, %v1188_v13, 0.0  ;;  %v1179_v38 = vsel %vm1077_vm2, %v1094_v24, %v1093_v8  ;;  %v898_v60 = vsel %vm886_vm1, %v897_v45, %v843_v12 }
 0x14a   : > { %v3910_v16 = vpack.c.bf16 %v1233_v62, %v1122_v39  ;;  %v1215_v18 = vsel %vm1191_vm4, %v1179_v38, 0.0  ;;  %v956_v55 = vsel %vm886_vm1, %v843_v12, %v897_v45  ;;  %v1117_v11 = vrot.slane %v811_v14, 1 }
 0x14b   : > { %4854 = vst [vmem:[#allocation9_spill] sm:$0xff] %v3904_v10  ;;  %v1118_v54 = vrot.slane %v812_v52, 1  ;;  %v3916_v6 = vpack.c.bf16 %v1215_v18, %v1095_v1  ;;  %v991_v44 = vsel %vm967_vm3, %v956_v55, 0.0  ;;  %v730_v8 = vmul.f32 %v3034_v51, %v3561_v19 }
 0x14c   : > { %v3920_v33 = vpack.c.bf16 %v898_v60, %v991_v44  ;;  %v731_v24 = vmul.f32 %v3035_v53, %v3561_v19  ;;  %v728_v45 = vmul.f32 %v3561_v19, %v630_v36  ;;  %v729_v14 = vmul.f32 %v3561_v19, %v633_v35 }
 0x14d   : > { %1660 = vrot.lane.b32.xlu1 %v3718_v26, %s3344_s22  ;;  %1502 = vrot.lane.b32.xlu0 %v3725_v29, %s3345_s12  ;;  %v769_v21 = vadd.f32 %v3568_v22, %v730_v8  ;;  %v914_v52 = vsel %vm886_vm1, %v913_v63, %v851_v3  ;;  %v964_v31 = vsel %vm886_vm1, %v851_v3, %v913_v63  ;;  %v3050_v3 = vpop.f32.mrb[12].mxu1 }
 0x14e   : > { %v770_v5 = vadd.f32 %v3568_v22, %v731_v24  ;;  %v1119_v46 = vsel %vm1077_vm2, %v1117_v11, %v1118_v54  ;;  %v1187_v49 = vsel %vm1077_vm2, %v1118_v54, %v1117_v11  ;;  %v1007_v56 = vsel %vm967_vm3, %v964_v31, 0.0  ;;  %v694_v9 = vpop.f32.mrb[13].mxu1 }
 0x14f   : > { %v801_v51 = vmax.f32 %v769_v21, 0.0  ;;  %v767_v59 = vadd.f32 %v3568_v22, %v728_v45  ;;  %v768_v36 = vadd.f32 %v3568_v22, %v729_v14  ;;  %v3944_v63 = vpack.c.bf16 %v914_v52, %v1007_v56  ;;  %v3051_v35 = vpop.f32.mrb[14].mxu1 }
 0x150   : > { %v802_v12 = vmax.f32 %v770_v5, 0.0  ;;  %v1231_v53 = vsel %vm1191_vm4, %v1187_v49, 0.0  ;;  %v744_v1 = vmul.f32 %v3561_v19, %v694_v9  ;;  %v697_v38 = vpop.f32.mrb[15].mxu1  ;;  %v746_v11 = vmul.f32 %v3050_v3, %v3561_v19 }
 0x151   : > { %1472 = vrot.lane.b32.xlu1 %v3750_v50, %s3340_s24  ;;  %1598 = vrot.lane.b32.xlu0 %v3686_v61, %s3347_s11  ;;  %v3948_v39 = vpack.c.bf16 %v1231_v53, %v1119_v46  ;;  %v799_v61 = vmax.f32 %v767_v59, 0.0  ;;  %v800_v62 = vmax.f32 %v768_v36, 0.0  ;;  %v745_v18 = vmul.f32 %v3561_v19, %v697_v38 }
 0x152   : > { %v3950_v13 = vpack.c.bf16 %v802_v12, %v801_v51  ;;  %v903_v60 = vrot.slane %v801_v51, 7  ;;  %v846_v55 = vrot.slane %v802_v12, 7  ;;  %v747_v54 = vmul.f32 %v3051_v35, %v3561_v19 }
 0x153   : > { %v1102_v44 = vrot.slane %v801_v51, 1  ;;  %v1103_v8 = vrot.slane %v802_v12, 1  ;;  %v783_v24 = vadd.f32 %v3568_v22, %v744_v1  ;;  %v784_v45 = vadd.f32 %v3568_v22, %v745_v18 }
 0x154   : > { %v3966_v14 = vpack.c.bf16 %v800_v62, %v799_v61  ;;  %v901_v21 = vrot.slane %v799_v61, 7  ;;  %v1099_v5 = vrot.slane %v799_v61, 1  ;;  %v845_v52 = vrot.slane %v800_v62, 7 }
 0x155   : > { %1728 = vrot.lane.b32.xlu0 %v3750_v50, %s3346_s21  ;;  %1556 = vrot.lane.b32.xlu1 %v3740_v42, %s4843_s28  ;;  %v1100_v31 = vrot.slane %v800_v62, 1  ;;  %v785_v19 = vadd.f32 %v3568_v22, %v746_v11  ;;  %v786_v46 = vadd.f32 %v3568_v22, %v747_v54  ;;  %v959_v49 = vsel %vm886_vm1, %v846_v55, %v903_v60 }
 0x156   : > { %v904_v51 = vsel %vm886_vm1, %v903_v60, %v846_v55  ;;  %v997_v12 = vsel %vm967_vm3, %v959_v49, 0.0  ;;  %v1104_v56 = vsel %vm1077_vm2, %v1102_v44, %v1103_v8  ;;  %v1182_v59 = vsel %vm1077_vm2, %v1103_v8, %v1102_v44 }
 0x157   : > { %v815_v36 = vmax.f32 %v783_v24, 0.0  ;;  %v816_v53 = vmax.f32 %v784_v45, 0.0  ;;  %v3980_v22 = vpack.c.bf16 %v904_v51, %v997_v12  ;;  %v1221_v3 = vsel %vm1191_vm4, %v1182_v59, 0.0 }
 0x158   : > { %v3984_v9 = vpack.c.bf16 %v1221_v3, %v1104_v56  ;;  %v1101_v35 = vsel %vm1077_vm2, %v1099_v5, %v1100_v31  ;;  %v1181_v61 = vsel %vm1077_vm2, %v1100_v31, %v1099_v5  ;;  %v902_v62 = vsel %vm886_vm1, %v901_v21, %v845_v52 }
 0x159   : > { %1518 = vrot.lane.b32.xlu0 %v3718_v26, %s3345_s12  ;;  %1414 = vrot.lane.b32.xlu1 %v3740_v42, %s3341_s20  ;;  %v958_v1 = vsel %vm886_vm1, %v845_v52, %v901_v21  ;;  %v817_v60 = vmax.f32 %v785_v19, 0.0  ;;  %v4000_v55 = vpack.c.bf16 %v816_v53, %v815_v36  ;;  %v818_v54 = vmax.f32 %v786_v46, 0.0 }
 0x15a   : > { %v995_v18 = vsel %vm967_vm3, %v958_v1, 0.0  ;;  %v917_v24 = vrot.slane %v815_v36, 7  ;;  %v1123_v45 = vrot.slane %v815_v36, 1  ;;  %v853_v5 = vrot.slane %v816_v53, 7  ;;  %v3204_v1 = vld [vmem:[%s4833_s4 + $0x8] sm:$0xff]  }
 0x15b   : > { %v4002_v11 = vpack.c.bf16 %v902_v62, %v995_v18  ;;  %v887_v44 = vrot.slane %v817_v60, 7  ;;  %v1078_v8 = vrot.slane %v817_v60, 1  ;;  %v1079_v21 = vrot.slane %v818_v54, 1  ;;  %3054 = vmatprep.subr.bf16.mxu1 %v3204_v1  ;;  %v1407_v18 = vpop.permute.xlu0 %1406 }
 0x15c   : > { %v1124_v52 = vrot.slane %v816_v53, 1  ;;  %v4012_v31 = vpack.c.bf16 %v818_v54, %v817_v60  ;;  %v966_v49 = vsel %vm886_vm1, %v853_v5, %v917_v24  ;;  %3055 = vmatpush3.bf16.msra.mxu1 %v3204_v1 }
 0x15d   : > { %1614 = vrot.lane.b32.xlu0 %v3750_v50, %s3347_s11  ;;  %1572 = vrot.lane.b32.xlu1 %v3765_v4, %s4843_s28  ;;  %v1219_v50 = vsel %vm1191_vm4, %v1181_v61, 0.0  ;;  %v1174_v19 = vsel %vm1077_vm2, %v1079_v21, %v1078_v8  ;;  %v1080_v56 = vsel %vm1077_vm2, %v1078_v8, %v1079_v21  ;;  %v918_v61 = vsel %vm886_vm1, %v917_v24, %v853_v5 }
 0x15e   : > { %v3992_v38 = vpack.c.bf16 %v1219_v50, %v1101_v35  ;;  %v1189_v46 = vsel %vm1077_vm2, %v1124_v52, %v1123_v45  ;;  %v1125_v53 = vsel %vm1077_vm2, %v1123_v45, %v1124_v52  ;;  %v1011_v62 = vsel %vm967_vm3, %v966_v49, 0.0  ;;  %3126 = vmatprep.subr.msk.bf16.mxu1 %vm2078_vm5, %v3205_v20 }
 0x15f   : > { %v1235_v3 = vsel %vm1191_vm4, %v1189_v46, 0.0  ;;  %v4040_v50 = vpack.c.bf16 %v918_v61, %v1011_v62 }
 0x160   : > { %v4035_v35 = vpack.c.bf16 %v1235_v3, %v1125_v53 }
 0x161   : > { %1684 = vrot.lane.b32.xlu0 %v3740_v42, %s4841_s27  ;;  %1430 = vrot.lane.b32.xlu1 %v3765_v4, %s3341_s20  ;;  %v838_v42 = vrot.slane %v818_v54, 7 }
 0x163   : > { %v888_v51 = vsel %vm886_vm1, %v887_v44, %v838_v42 }
 0x165   : > { %1700 = vrot.lane.b32.xlu0 %v3765_v4, %s4841_s27  ;;  %1682 = vrot.lane.b32.xlu1 %v3746_v23, %s4841_s27  ;;  %v951_v4 = vsel %vm886_vm1, %v838_v42, %v887_v44 }
 0x166   : > { %v1286_v12 = vsel %vm967_vm3, %v951_v4, 0.0 }
 0x167   : > { %v4024_v59 = vpack.c.bf16 %v888_v51, %v1286_v12 }
 0x169   : > { %1554 = vrot.lane.b32.xlu0 %v3746_v23, %s4843_s28  ;;  %1412 = vrot.lane.b32.xlu1 %v3746_v23, %s3341_s20  ;;  %v1355_v23 = vsel %vm1191_vm4, %v1174_v19, 0.0 }
 0x16a   : > { %v4026_v36 = vpack.c.bf16 %v1355_v23, %v1080_v56  ;;  %v1749_v56 = vsel %vm1746_vm6, 0.0|0.0, %v1407_v18 }
 0x16d   : > { %1570 = vrot.lane.b32.xlu0 %v3777_v15, %s4843_s28  ;;  %1698 = vrot.lane.b32.xlu1 %v3777_v15, %s4841_s27  ;;  %s4855_s27 = smov 16   ;;  %s4857_s28 = smov 28  }
 0x171   : > { %1650 = vrot.lane.b32.xlu0 %v3759_v58, %s3344_s22  ;;  %1428 = vrot.lane.b32.xlu1 %v3777_v15, %s3341_s20  ;;  %v2080_v15 = vsel %vm2078_vm5, %v3205_v20, 0 }
 0x172   : > { %3057 = vmatpush3.bf16.msra.mxu1 %v2080_v15 }
 0x175   : > { %1718 = vrot.lane.b32.xlu0 %v3779_v48, %s3346_s21  ;;  %1508 = vrot.lane.b32.xlu1 %v3759_v58, %s3345_s12 }
 0x179   : > { %1462 = vrot.lane.b32.xlu0 %v3779_v48, %s3340_s24  ;;  %1604 = vrot.lane.b32.xlu1 %v3779_v48, %s3347_s11  ;;  %v1455_v48 = vpop.permute.xlu1 %1454 }
 0x17d   : > { %1666 = vrot.lane.b32.xlu0 %v3796_v47, %s3344_s22  ;;  %1524 = vrot.lane.b32.xlu1 %v3796_v47, %s3345_s12 }
 0x181   : > { %1734 = vrot.lane.b32.xlu0 %v3803_v30, %s3346_s21  ;;  %1620 = vrot.lane.b32.xlu1 %v3803_v30, %s3347_s11 }
 0x185   : > { %1478 = vrot.lane.b32.xlu0 %v3803_v30, %s3340_s24  ;;  %1648 = vrot.lane.b32.xlu1 %v3793_v28, %s3344_s22 }
 0x189   : > { %1716 = vrot.lane.b32.xlu0 %v3822_v43, %s3346_s21  ;;  %1460 = vrot.lane.b32.xlu1 %v3822_v43, %s3340_s24 }
 0x18d   : > { %1506 = vrot.lane.b32.xlu0 %v3793_v28, %s3345_s12  ;;  %1664 = vrot.lane.b32.xlu1 %v3844_v2, %s3344_s22 }
 0x191   : > { %1602 = vrot.lane.b32.xlu0 %v3822_v43, %s3347_s11  ;;  %1476 = vrot.lane.b32.xlu1 %v3870_v37, %s3340_s24 }
 0x193   : > { %v4089_v30 = vpop.permute.xlu0 %1680  ;;  %v4091_v60 = vpop.permute.xlu1 %1552 }
 0x195   : > { %1732 = vrot.lane.b32.xlu0 %v3870_v37, %s3346_s21  ;;  %1560 = vrot.lane.b32.xlu1 %v3863_v25, %s4855_s27 }
 0x197   : > { %v4097_v54 = vpop.permute.xlu0 %1696  ;;  %v4099_v44 = vpop.permute.xlu1 %1410 }
 0x198   : > { %4856 = vst [vmem:[#allocation10_spill] sm:$0xff] %v4097_v54 }
 0x199   : > { %1522 = vrot.lane.b32.xlu0 %v3844_v2, %s3345_s12  ;;  %1418 = vrot.lane.b32.xlu1 %v3863_v25, %s3341_s20 }
 0x19b   : > { %v4105_v43 = vpop.permute.xlu1 %1568  ;;  %v4107_v8 = vpop.permute.xlu0 %1408 }
 0x19d   : > { %1618 = vrot.lane.b32.xlu0 %v3870_v37, %s3347_s11  ;;  %1576 = vrot.lane.b32.xlu1 %v3873_v41, %s4855_s27 }
 0x19f   : > { %v4113_v24 = vpop.permute.xlu1 %1426  ;;  %v1551_v45 = vpop.permute.xlu0 %1550 }
 0x1a1   : > { %1688 = vrot.lane.b32.xlu0 %v3863_v25, %s4857_s28  ;;  %1686 = vrot.lane.b32.xlu1 %v3867_v27, %s4857_s28 }
 0x1a3   : > { %v4119_v42 = vpop.permute.xlu1 %1694  ;;  %v4121_v21 = vpop.permute.xlu0 %1566 }
 0x1a5   : > { %1704 = vrot.lane.b32.xlu0 %v3873_v41, %s4857_s28  ;;  %1416 = vrot.lane.b32.xlu1 %v3867_v27, %s3341_s20 }
 0x1a7   : > { %v4127_v37 = vpop.permute.xlu1 %1424  ;;  %v1647_v5 = vpop.permute.xlu0 %1646 }
 0x1a9   : > { %1558 = vrot.lane.b32.xlu0 %v3867_v27, %s4855_s27  ;;  %1702 = vrot.lane.b32.xlu1 %v3892_v0, %s4857_s28 }
 0x1ab   : > { %v4133_v25 = vpop.permute.xlu1 %1504  ;;  %v1715_v52 = vpop.permute.xlu0 %1714 }
 0x1ad   : > { %1574 = vrot.lane.b32.xlu0 %v3892_v0, %s4855_s27  ;;  %1432 = vrot.lane.b32.xlu1 %v3892_v0, %s3341_s20 }
 0x1af   : > { %v4139_v4 = vpop.permute.xlu1 %1600  ;;  %v4141_v19 = vpop.permute.xlu0 %1458 }
 0x1b1   : > { %1654 = vrot.lane.b32.xlu0 %v3887_v57, %s3344_s22  ;;  %1512 = vrot.lane.b32.xlu1 %v3887_v57, %s3345_s12 }
 0x1b3   : > { %v4147_v27 = vpop.permute.xlu1 %1520  ;;  %v4149_v46 = vpop.permute.xlu0 %1662 }
 0x1b5   : > { %1722 = vrot.lane.b32.xlu0 %v3894_v7, %s3346_s21  ;;  %1608 = vrot.lane.b32.xlu1 %v3894_v7, %s3347_s11 }
 0x1b7   : > { %v4155_v0 = vpop.permute.xlu1 %1616  ;;  %v4157_v49 = vpop.permute.xlu0 %1730 }
 0x1b8   : > { %4858 = vst [vmem:[#allocation11_spill] sm:$0xff] %v4157_v49 }
 0x1b9   : > { %1466 = vrot.lane.b32.xlu0 %v3894_v7, %s3340_s24  ;;  %1528 = vrot.lane.b32.xlu1 %v3904_v10, %s3345_s12  ;;  %v1797_v7 = vsel %vm1795_vm7, %v1749_v56, %v1455_v48 }
 0x1bb   : > { %v4163_v51 = vpop.permute.xlu1 %1456  ;;  %v4165_v12 = vpop.permute.xlu0 %1474 }
 0x1bd   : > { %1670 = vrot.lane.b32.xlu0 %v3904_v10, %s3344_s22  ;;  %1624 = vrot.lane.b32.xlu1 %v3910_v16, %s3347_s11 }
 0x1bf   : > { %v4172_v23 = vpop.permute.xlu1 %1660  ;;  %v1503_v53 = vpop.permute.xlu0 %1502 }
 0x1c0   : > { %v1830_v3 = vsel %vm1828_vm8, %v1797_v7, %v1503_v53 }
 0x1c1   : > { %1720 = vrot.lane.b32.xlu0 %v3916_v6, %s3346_s21  ;;  %1652 = vrot.lane.b32.xlu1 %v3920_v33, %s3344_s22  ;;  %v1862_v62 = vsel %vm499_vm0, %v1830_v3, %v1551_v45 }
 0x1c3   : > { %v4180_v61 = vpop.permute.xlu1 %1472  ;;  %v1599_v32 = vpop.permute.xlu0 %1598 }
 0x1c4   : > { %v1895_v1 = vsel %vm1893_vm10, %v1862_v62, %v1599_v32 }
 0x1c5   : > { %v1928_v20 = vsel %vm1926_vm9, %v1895_v1, %v1647_v5  ;;  %1510 = vrot.lane.b32.xlu0 %v3920_v33, %s3345_s12  ;;  %1464 = vrot.lane.b32.xlu1 %v3916_v6, %s3340_s24 }
 0x1c6   : > { %v1961_v15 = vsel %vm1959_vm11, %v1928_v20, %v4089_v30 }
 0x1c7   : > { %v4191_v48 = vpop.permute.xlu0 %1728  ;;  %v4193_v18 = vpop.permute.xlu1 %1556  ;;  %v1994_v45 = vsel %vm1992_vm12, %v1961_v15, %v1715_v52 }
 0x1c8   : > { %4859 = vst [vmem:[#allocation12_spill] sm:$0xff] %v4191_v48  ;;  %3058 = vmatprep.mubr.msk.bf16.mxu1 %vm2045_vm13, %v1994_v45  ;;  %v1752_v48 = vsel %vm1746_vm6, %v3725_v29, %v4107_v8 }
 0x1c9   : > { %1606 = vrot.lane.b32.xlu0 %v3916_v6, %s3347_s11  ;;  %1668 = vrot.lane.b32.xlu1 %v3944_v63, %s3344_s22 }
 0x1cb   : > { %v4201_v5 = vpop.permute.xlu0 %1518  ;;  %v1415_v56 = vpop.permute.xlu1 %1414 }
 0x1cc   : > { %v1761_v45 = vsel %vm1746_vm6, %v3759_v58, %v1415_v56 }
 0x1cd   : > { %1736 = vrot.lane.b32.xlu0 %v3948_v39, %s3346_s21  ;;  %1480 = vrot.lane.b32.xlu1 %v3948_v39, %s3340_s24 }
 0x1cf   : > { %v4207_v30 = vpop.permute.xlu0 %1614  ;;  %v4209_v52 = vpop.permute.xlu1 %1572 }
 0x1d1   : > { %1526 = vrot.lane.b32.xlu0 %v3944_v63, %s3345_s12  ;;  %1564 = vrot.lane.b32.xlu1 %v3950_v13, %s4855_s27 }
 0x1d3   : > { %v4215_v6 = vpop.permute.xlu0 %1684  ;;  %v1431_v7 = vpop.permute.xlu1 %1430 }
 0x1d5   : > { %1622 = vrot.lane.b32.xlu0 %v3948_v39, %s3347_s11  ;;  %1422 = vrot.lane.b32.xlu1 %v3950_v13, %s3341_s20 }
 0x1d7   : > { %v4221_v53 = vpop.permute.xlu0 %1700  ;;  %v1683_v3 = vpop.permute.xlu1 %1682 }
 0x1d9   : > { %1692 = vrot.lane.b32.xlu0 %v3950_v13, %s4857_s28  ;;  %1690 = vrot.lane.b32.xlu1 %v3966_v14, %s4857_s28 }
 0x1db   : > { %v4227_v62 = vpop.permute.xlu0 %1554  ;;  %v1413_v32 = vpop.permute.xlu1 %1412 }
 0x1dd   : > { %1562 = vrot.lane.b32.xlu0 %v3966_v14, %s4855_s27  ;;  %1420 = vrot.lane.b32.xlu1 %v3966_v14, %s3341_s20 }
 0x1df   : > { %v4233_v39 = vpop.permute.xlu0 %1570  ;;  %v1699_v1 = vpop.permute.xlu1 %1698 }
 0x1e1   : > { %1658 = vrot.lane.b32.xlu0 %v3980_v22, %s3344_s22  ;;  %1706 = vrot.lane.b32.xlu1 %v4000_v55, %s4857_s28 }
 0x1e3   : > { %v4239_v13 = vpop.permute.xlu0 %1650  ;;  %v1429_v20 = vpop.permute.xlu1 %1428 }
 0x1e5   : > { %1726 = vrot.lane.b32.xlu0 %v3984_v9, %s3346_s21  ;;  %1516 = vrot.lane.b32.xlu1 %v3980_v22, %s3345_s12 }
 0x1e7   : > { %v4245_v15 = vpop.permute.xlu0 %1718  ;;  %v1509_v14 = vpop.permute.xlu1 %1508 }
 0x1e9   : > { %1470 = vrot.lane.b32.xlu0 %v3984_v9, %s3340_s24  ;;  %1612 = vrot.lane.b32.xlu1 %v3984_v9, %s3347_s11  ;;  %v1799_v9 = vsel %vm1795_vm7, %v1752_v48, %v4163_v51  ;;  %v1776_v51 = vsel %vm1746_vm6, %v3718_v26, %v4127_v37  ;;  %v1785_v48 = vsel %vm1746_vm6, %v3796_v47, %v1431_v7 }
 0x1ea   : > { %v1758_v47 = vsel %vm1746_vm6, %v3793_v28, %v1413_v32  ;;  %v1755_v28 = vsel %vm1746_vm6, %v3644_v34, %v4099_v44 }
 0x1eb   : > { %v1463_v17 = vpop.permute.xlu0 %1462  ;;  %v1605_v10 = vpop.permute.xlu1 %1604 }
 0x1ec   : > { %v4254_v49 = vsel %vm1795_vm7, %v1761_v45, %v1463_v17  ;;  %v1832_v17 = vsel %vm1828_vm8, %v1799_v9, %v4133_v25  ;;  %v1815_v25 = vsel %vm1795_vm7, %v1776_v51, %v4180_v61 }
 0x1ed   : > { %1724 = vrot.lane.b32.xlu0 %v3992_v38, %s3346_s21  ;;  %1656 = vrot.lane.b32.xlu1 %v4002_v11, %s3344_s22  ;;  %v1864_v56 = vsel %vm499_vm0, %v1832_v17, %v4091_v60 }
 0x1ee   : > { %v1897_v60 = vsel %vm1893_vm10, %v1864_v56, %v4139_v4 }
 0x1ef   : > { %v4265_v54 = vpop.permute.xlu0 %1666  ;;  %v1525_v58 = vpop.permute.xlu1 %1524 }
 0x1f1   : > { %1514 = vrot.lane.b32.xlu0 %v4002_v11, %s3345_s12  ;;  %1468 = vrot.lane.b32.xlu1 %v3992_v38, %s3340_s24 }
 0x1f3   : > { %v4273_v29 = vpop.permute.xlu0 %1734  ;;  %v1621_v8 = vpop.permute.xlu1 %1620 }
 0x1f5   : > { %1610 = vrot.lane.b32.xlu0 %v3992_v38, %s3347_s11  ;;  %1434 = vrot.lane.b32.xlu1 %v3873_v41, %s3341_s20  ;;  %v1848_v38 = vsel %vm1828_vm8, %v1815_v25, %v4147_v27 }
 0x1f6   : > { %v1880_v27 = vsel %vm499_vm0, %v1848_v38, %v4105_v43  ;;  %v1801_v43 = vsel %vm1795_vm7, %v1755_v28, %v4141_v19  ;;  %v1782_v19 = vsel %vm1746_vm6, %v3844_v2, %v1429_v20 }
 0x1f7   : > { %v1479_v45 = vpop.permute.xlu0 %1478  ;;  %v1649_v9 = vpop.permute.xlu1 %1648 }
 0x1f8   : > { %v4291_v17 = vsel %vm1795_vm7, %v1785_v48, %v1479_v45  ;;  %v1930_v26 = vsel %vm1926_vm9, %v1897_v60, %v1649_v9 }
 0x1f9   : > { %1738 = vrot.lane.b32.xlu0 %v3910_v16, %s3346_s21  ;;  %1436 = vrot.lane.b32.xlu1 %v4000_v55, %s3341_s20  ;;  %v1963_v37 = vsel %vm1959_vm11, %v1930_v26, %v1683_v3 }
 0x1fb   : > { %v1717_v41 = vpop.permute.xlu0 %1716  ;;  %v1461_v4 = vpop.permute.xlu1 %1460 }
 0x1fc   : > { %v1996_v61 = vsel %vm1992_vm12, %v1963_v37, %v1717_v41  ;;  %v1803_v7 = vsel %vm1795_vm7, %v1758_v47, %v1461_v4 }
 0x1fd   : > { %v1836_v56 = vsel %vm1828_vm8, %v1803_v7, %v1509_v14  ;;  %3059 = vmatmul.mubr.msk.bf16.vlgmr.msra.gmra.mrb[16].mxu1 %vm2045_vm13, %v1996_v61  ;;  %1482 = vrot.lane.b32.xlu0 %v3910_v16, %s3340_s24  ;;  %v1913_v14 = vsel %vm1893_vm10, %v1880_v27, %v4155_v0 }
 0x1fe   : > { %1532 = vrot.lane.b32.xlu1 %v4024_v59, %s3345_s12  ;;  %v1868_v3 = vsel %vm499_vm0, %v1836_v56, %v4193_v18 }
 0x1ff   : > { %v1507_v32 = vpop.permute.xlu0 %1506  ;;  %v1665_v51 = vpop.permute.xlu1 %1664  ;;  %v4323_v16 = vsel %vm1893_vm10, %v1868_v3, %v1605_v10 }
 0x200   : > { %v1834_v25 = vsel %vm1828_vm8, %v1801_v43, %v1507_v32  ;;  %v1946_v34 = vsel %vm1926_vm9, %v1913_v14, %v1665_v51 }
 0x201   : > { %1578 = vrot.lane.b32.xlu0 %v4000_v55, %s4855_s27  ;;  %v1979_v44 = vsel %vm1959_vm11, %v1946_v34, %v1699_v1  ;;  %v1866_v0 = vsel %vm499_vm0, %v1834_v25, %v4227_v62 }
 0x202   : > { %1580 = vrot.lane.b32.xlu1 %v4012_v31, %s4855_s27 }
 0x203   : > { %v1603_v10 = vpop.permute.xlu0 %1602  ;;  %v1477_v18 = vpop.permute.xlu1 %1476 }
 0x204   : > { %v1899_v48 = vsel %vm1893_vm10, %v1866_v0, %v1603_v10  ;;  %v1819_v45 = vsel %vm1795_vm7, %v1782_v19, %v1477_v18 }
 0x205   : > { %v1932_v55 = vsel %vm1926_vm9, %v1899_v48, %v4239_v13  ;;  %v1852_v1 = vsel %vm1828_vm8, %v1819_v45, %v1525_v58  ;;  %1674 = vrot.lane.b32.xlu0 %v4024_v59, %s3344_s22  ;;  %v1779_v59 = vsel %vm1746_vm6, %v3655_v40, %v4113_v24 }
 0x206   : > { %1628 = vrot.lane.b32.xlu1 %v4026_v36, %s3347_s11  ;;  %v1965_v2 = vsel %vm1959_vm11, %v1932_v55, %v4215_v6  ;;  %v1884_v62 = vsel %vm499_vm0, %v1852_v1, %v4209_v52  ;;  %v4860_v52 = vmov 0.0|0.0   ;;  %v1817_v6 = vsel %vm1795_vm7, %v1779_v59, %v4165_v12 }
 0x207   : > { %v1733_v20 = vpop.permute.xlu0 %1732  ;;  %v1561_v60 = vpop.permute.xlu1 %1560  ;;  %v1998_v9 = vsel %vm1992_vm12, %v1965_v2, %v4245_v15  ;;  %v1917_v13 = vsel %vm1893_vm10, %v1884_v62, %v1621_v8 }
 0x208   : > { %v4353_v58 = vsel %vm1992_vm12, %v1979_v44, %v1733_v20  ;;  %3062 = vmatprep.mubr.msk.bf16.mxu1 %vm2045_vm13, %v1998_v9 }
 0x209   : > { %1708 = vrot.lane.b32.xlu0 %v4012_v31, %s4857_s28 }
 0x20a   : > { %1676 = vrot.lane.b32.xlu1 %v4860_v52, %s3344_s22 }
 0x20b   : > { %v1523_v15 = vpop.permute.xlu0 %1522  ;;  %v4365_v8 = vpop.permute.xlu1 %1418 }
 0x20c   : > { %v1850_v26 = vsel %vm1828_vm8, %v1817_v6, %v1523_v15 }
 0x20d   : > { %1740 = vrot.lane.b32.xlu0 %v4035_v35, %s3346_s21  ;;  %v1882_v31 = vsel %vm499_vm0, %v1850_v26, %v4233_v39 }
 0x20e   : > { %1672 = vrot.lane.b32.xlu1 %v4040_v50, %s3344_s22  ;;  %s2883_s22 = sshll.u32 %s3509_s18, 8 }
 0x20f   : > { %v1619_v40 = vpop.permute.xlu0 %1618  ;;  %v1577_v24 = vpop.permute.xlu1 %1576 }
 0x210   : > { %v1915_v38 = vsel %vm1893_vm10, %v1882_v31, %v1619_v40 }
 0x211   : > { %v1948_v12 = vsel %vm1926_vm9, %v1915_v38, %v4265_v54  ;;  %1530 = vrot.lane.b32.xlu0 %v4040_v50, %s3345_s12  ;;  %s4641_s12 = scalar_lea.vmem [#allocation5], %s2883_s22 }
 0x212   : > { %1484 = vrot.lane.b32.xlu1 %v4035_v35, %s3340_s24  ;;  %v1981_v47 = vsel %vm1959_vm11, %v1948_v12, %v4221_v53 }
 0x213   : > { %v1689_v39 = vpop.permute.xlu0 %1688  ;;  %v1687_v41 = vpop.permute.xlu1 %1686  ;;  %v4385_v37 = vsel %vm1992_vm12, %v1981_v47, %v4273_v29 }
 0x215   : > { %1626 = vrot.lane.b32.xlu0 %v4035_v35, %s3347_s11 }
 0x216   : > { %1710 = vrot.lane.b32.xlu1 %v4860_v52, %s4857_s28  ;;  %s3348_s28 = smov [#allocation5]  }
 0x217   : > { %v1705_v54 = vpop.permute.xlu0 %1704  ;;  %v1417_v4 = vpop.permute.xlu1 %1416  ;;  %s3272_s20 = sshll.u32 %s3348_s28, 4  ;;  %s3273_s20 = int_to_ptr.vmem [resolvable:$false] %s3272_s20 }
 0x218   : > { %v1764_v19 = vsel %vm1746_vm6, %v3920_v33, %v1417_v4  ;;  %s3274_s22 = scalar_lea.vmem %s3273_s20, 8192 }
 0x219   : > { %1742 = vrot.lane.b32.xlu0 %v4026_v36, %s3346_s21 }
 0x21a   : > { %1744 = vrot.lane.b32.xlu1 %v4860_v52, %s3346_s21  ;;  %s2802_s21 = sshll.u32 %s4641_s12, 4  ;;  %s4780_s21 = int_to_ptr.vmem [resolvable:$true] %s2802_s21 }
 0x21b   : > { %v1559_v53 = vpop.permute.xlu0 %1558  ;;  %v1703_v61 = vpop.permute.xlu1 %1702  ;;  %s3268_s27 = scalar_lea.vmem %s4780_s21, 4096  ;;  %p3275_p8 = scmp.lt.s32.totalorder %s4780_s21, %s3273_s20 }
 0x21c   : > { %p3269_p6 = scmp.ne.s32.totalorder %s4780_s21, %s3268_s27  ;;  %p3276_p10 = scmp.lt.s32.totalorder %s3274_s22, %s3268_s27 }
 0x21e   : > { %p3270_p12 = pnand %p3269_p6, %p4865_p11  ;;  %p3277_p0 = por %p3276_p10, %p3275_p8 }
 0x21f   : > { %v1575_v7 = vpop.permute.xlu0 %1574  ;;  %v1433_v27 = vpop.permute.xlu1 %1432 }
 0x220   : > { %v1788_v59 = vsel %vm1746_vm6, %v3944_v63, %v1433_v27  ;;  %p3271_p13 = pneg %p3270_p12 }
 0x222   : > { %p3278_p2 = pnand %p3277_p0, %p3271_p13 }
 0x223   : > { %v1655_v29 = vpop.permute.xlu0 %1654  ;;  %v1513_v56 = vpop.permute.xlu1 %1512 }
 0x227   : > { %v1723_v28 = vpop.permute.xlu0 %1722  ;;  %v4395_v3 = vpop.permute.xlu1 %1608 }
 0x22b   : > { %v4397_v35 = vpop.permute.xlu0 %1466  ;;  %v1529_v43 = vpop.permute.xlu1 %1528 }
 0x22f   : > { %v1671_v32 = vpop.permute.xlu0 %1670  ;;  %v1625_v14 = vpop.permute.xlu1 %1624 }
 0x233   : > { %v1721_v51 = vpop.permute.xlu0 %1720  ;;  %v1653_v25 = vpop.permute.xlu1 %1652 }
 0x234   : > { %v1934_v36 = vsel %vm1926_vm9, %v4323_v16, %v1653_v25 }
 0x235   : > { %v1967_v34 = vsel %vm1959_vm11, %v1934_v36, %v1687_v41 }
 0x236   : > { %v2000_v44 = vsel %vm1992_vm12, %v1967_v34, %v1721_v51 }
 0x237   : > { %v1511_v0 = vpop.permute.xlu0 %1510  ;;  %3063 = vmatmul.mubr.msk.bf16.gmra.mrb[20].mxu1 %vm2045_vm13, %v2000_v44  ;;  %v1465_v10 = vpop.permute.xlu1 %1464 }
 0x238   : > { %v1838_v18 = vsel %vm1828_vm8, %v4254_v49, %v1511_v0  ;;  %v1807_v48 = vsel %vm1795_vm7, %v1764_v19, %v1465_v10 }
 0x239   : > { %v1840_v45 = vsel %vm1828_vm8, %v1807_v48, %v1513_v56  ;;  %v1870_v55 = vsel %vm499_vm0, %v1838_v18, %v1559_v53  ;;  %v1767_v18 = vsel %vm1746_vm6, %v3887_v57, %v4365_v8 }
 0x23a   : > { %v1872_v16 = vsel %vm499_vm0, %v1840_v45, %v1561_v60 }
 0x23b   : > { %v1607_v1 = vpop.permute.xlu0 %1606  ;;  %v1669_v2 = vpop.permute.xlu1 %1668  ;;  %v1905_v44 = vsel %vm1893_vm10, %v1872_v16, %v4395_v3 }
 0x23c   : > { %v1903_v62 = vsel %vm1893_vm10, %v1870_v55, %v1607_v1  ;;  %v1950_v33 = vsel %vm1926_vm9, %v1917_v13, %v1669_v2 }
 0x23d   : > { %v1936_v20 = vsel %vm1926_vm9, %v1903_v62, %v1655_v29  ;;  %v4416_v9 = vsel %vm1959_vm11, %v1950_v33, %v1703_v61 }
 0x23e   : > { %v1969_v49 = vsel %vm1959_vm11, %v1936_v20, %v1689_v39 }
 0x23f   : > { %v4421_v52 = vpop.permute.xlu0 %1736  ;;  %v1481_v60 = vpop.permute.xlu1 %1480  ;;  %v2002_v6 = vsel %vm1992_vm12, %v1969_v49, %v1723_v28 }
 0x240   : > { %v1823_v15 = vsel %vm1795_vm7, %v1788_v59, %v1481_v60  ;;  %3066 = vmatprep.mubr.msk.bf16.mxu1 %vm2045_vm13, %v2002_v6  ;;  %v4861_v6 = vld [vmem:[#allocation10_spill] sm:$0xff] }
 0x241   : > { %v1856_v13 = vsel %vm1828_vm8, %v1823_v15, %v1529_v43 }
 0x242   : > { %v1888_v26 = vsel %vm499_vm0, %v1856_v13, %v1577_v24 }
 0x243   : > { %v1527_v31 = vpop.permute.xlu0 %1526  ;;  %v1565_v40 = vpop.permute.xlu1 %1564  ;;  %v4429_v38 = vsel %vm1893_vm10, %v1888_v26, %v1625_v14 }
 0x244   : > { %v1854_v63 = vsel %vm1828_vm8, %v4291_v17, %v1527_v31 }
 0x245   : > { %v1886_v12 = vsel %vm499_vm0, %v1854_v63, %v1575_v7  ;;  %v2369_v7 = vld [vmem:[%s4836_s7] sm:$0x3] }
 0x246   : > { %3127 = vmatprep.subr.msk.bf16.mxu0 %vm2078_vm5, %v2369_v7 }
 0x247   : > { %v1623_v47 = vpop.permute.xlu0 %1622  ;;  %v1423_v39 = vpop.permute.xlu1 %1422 }
 0x248   : > { %v1919_v41 = vsel %vm1893_vm10, %v1886_v12, %v1623_v47  ;;  %v1773_v14 = vsel %vm1746_vm6, %v3980_v22, %v1423_v39 }
 0x249   : > { %v1952_v4 = vsel %vm1926_vm9, %v1919_v41, %v1671_v32 }
 0x24a   : > { %v4437_v53 = vsel %vm1959_vm11, %v1952_v4, %v1705_v54  ;;  %v2419_v54 = vsel %vm2078_vm5, %v2369_v7, 0 }
 0x24b   : > { %v1693_v24 = vpop.permute.xlu0 %1692  ;;  %v1691_v61 = vpop.permute.xlu1 %1690  ;;  %3091 = vmatpush3.bf16.msra.mxu0 %v2419_v54 }
 0x24f   : > { %v1563_v27 = vpop.permute.xlu0 %1562  ;;  %v1421_v29 = vpop.permute.xlu1 %1420 }
 0x250   : > { %v1770_v3 = vsel %vm1746_vm6, %v4002_v11, %v1421_v29 }
 0x253   : > { %v1659_v56 = vpop.permute.xlu0 %1658  ;;  %v4439_v28 = vpop.permute.xlu1 %1706 }
 0x257   : > { %v1727_v43 = vpop.permute.xlu0 %1726  ;;  %v1517_v17 = vpop.permute.xlu1 %1516 }
 0x25b   : > { %v1471_v32 = vpop.permute.xlu0 %1470  ;;  %v1613_v51 = vpop.permute.xlu1 %1612 }
 0x25c   : > { %v1813_v25 = vsel %vm1795_vm7, %v1773_v14, %v1471_v32 }
 0x25d   : > { %v1846_v36 = vsel %vm1828_vm8, %v1813_v25, %v4201_v5  ;;  %v1809_v5 = vsel %vm1795_vm7, %v1767_v18, %v4397_v35 }
 0x25e   : > { %v1878_v22 = vsel %vm499_vm0, %v1846_v36, %v4121_v21 }
 0x25f   : > { %v1725_v34 = vpop.permute.xlu0 %1724  ;;  %v1657_v19 = vpop.permute.xlu1 %1656  ;;  %v1911_v21 = vsel %vm1893_vm10, %v1878_v22, %v4207_v30 }
 0x260   : > { %v1938_v0 = vsel %vm1926_vm9, %v1905_v44, %v1657_v19  ;;  %v1944_v33 = vsel %vm1926_vm9, %v1911_v21, %v4149_v46  ;;  %v4862_v46 = vld [vmem:[#allocation12_spill] sm:$0xff]  ;;  %v4538_v21 = vld [vmem:[%s4835_s6] ss:$0 sm:$0xff] }
 0x261   : > { %v1971_v10 = vsel %vm1959_vm11, %v1938_v0, %v1691_v61  ;;  %v1977_v15 = vsel %vm1959_vm11, %v1944_v33, %v4861_v6  ;;  %v2016_v61 = vsel %vm1992_vm12, %v4416_v9, %v4421_v52 }
 0x262   : > { %v2004_v48 = vsel %vm1992_vm12, %v1971_v10, %v1725_v34 }
 0x263   : > { %v1515_v45 = vpop.permute.xlu0 %1514  ;;  %3067 = vmatmul.mubr.msk.bf16.gmra.mrb[24].mxu1 %vm2045_vm13, %v2004_v48  ;;  %v1469_v16 = vpop.permute.xlu1 %1468 }
 0x264   : > { %v1842_v55 = vsel %vm1828_vm8, %v1809_v5, %v1515_v45  ;;  %v1811_v1 = vsel %vm1795_vm7, %v1770_v3, %v1469_v16  ;;  %v4533_v45 = vld [vmem:[%s4834_s5] ss:$0 sm:$0xff] }
 0x265   : > { %v1844_v57 = vsel %vm1828_vm8, %v1811_v1, %v1517_v17  ;;  %v1874_v2 = vsel %vm499_vm0, %v1842_v55, %v1563_v27 }
 0x266   : > { %v1876_v8 = vsel %vm499_vm0, %v1844_v57, %v1565_v40 }
 0x267   : > { %v1909_v35 = vsel %vm1893_vm10, %v1876_v8, %v1613_v51  ;;  %v1611_v11 = vpop.permute.xlu0 %1610  ;;  %v1435_v62 = vpop.permute.xlu1 %1434 }
 0x268   : > { %v1907_v20 = vsel %vm1893_vm10, %v1874_v2, %v1611_v11  ;;  %v1942_v30 = vsel %vm1926_vm9, %v1909_v35, %v4172_v23  ;;  %v4863_v23 = vld [vmem:[#allocation11_spill] sm:$0xff] }
 0x269   : > { %v1940_v49 = vsel %vm1926_vm9, %v1907_v20, %v1659_v56  ;;  %v1975_v59 = vsel %vm1959_vm11, %v1942_v30, %v4119_v42  ;;  %v2010_v63 = vsel %vm1992_vm12, %v1977_v15, %v4863_v23 }
 0x26a   : > { %v1973_v60 = vsel %vm1959_vm11, %v1940_v49, %v1693_v24  ;;  %v2008_v40 = vsel %vm1992_vm12, %v1975_v59, %v4862_v46 }
 0x26b   : > { %v1739_v13 = vpop.permute.xlu0 %1738  ;;  %v1437_v26 = vpop.permute.xlu1 %1436  ;;  %v2006_v31 = vsel %vm1992_vm12, %v1973_v60, %v1727_v43  ;;  %v4864_v43 = vld [vmem:[#allocation9_spill] sm:$0xff] }
 0x26c   : > { %3070 = vmatprep.mubr.msk.bf16.mxu1 %vm2045_vm13, %v2006_v31  ;;  %v2018_v29 = vsel %vm1992_vm12, %v4437_v53, %v1739_v13  ;;  %v1791_v17 = vsel %vm1746_vm6, %v4864_v43, %v1435_v62  ;;  %v1794_v53 = vsel %vm1746_vm6, %v4040_v50, %v1437_v26 }
 0x26d   : > { %3071 = vmatmul.mubr.msk.bf16.gmra.mrb[28].mxu1 %vm2045_vm13, %v2008_v40 }
 0x26e   : > { %3074 = vmatprep.mubr.msk.bf16.mxu1 %vm2045_vm13, %v2010_v63 }
 0x26f   : > { %v1483_v42 = vpop.permute.xlu0 %1482 }
 0x270   : > { %v1533_v12 = vpop.permute.xlu1 %1532  ;;  %v1825_v9 = vsel %vm1795_vm7, %v1791_v17, %v1483_v42 }
 0x273   : > { %v1579_v47 = vpop.permute.xlu0 %1578 }
 0x274   : > { %v1581_v39 = vpop.permute.xlu1 %1580 }
 0x275   : > { %3075 = vmatmul.mubr.msk.bf16.gmra.mrb[32].mxu1 %vm2045_vm13, %v4353_v58 }
 0x276   : > { %3078 = vmatprep.mubr.msk.bf16.mxu1 %vm2045_vm13, %v4385_v37 }
 0x277   : > { %v1675_v41 = vpop.permute.xlu0 %1674 }
 0x278   : > { %v1629_v4 = vpop.permute.xlu1 %1628 }
 0x27b   : > { %v1709_v24 = vpop.permute.xlu0 %1708 }
 0x27c   : > { %v1677_v27 = vpop.permute.xlu1 %1676 }
 0x27d   : > { %3079 = vmatmul.mubr.msk.bf16.gmra.mrb[36].mxu1 %vm2045_vm13, %v2016_v61 }
 0x27e   : > { %3082 = vmatprep.mubr.msk.bf16.mxu1 %vm2045_vm13, %v2018_v29 }
 0x27f   : > { %v1741_v56 = vpop.permute.xlu0 %1740 }
 0x280   : > { %v1673_v58 = vpop.permute.xlu1 %1672 }
 0x281   : > { %v1954_v37 = vsel %vm1926_vm9, %v4429_v38, %v1673_v58 }
 0x282   : > { %v1987_v7 = vsel %vm1959_vm11, %v1954_v37, %v4439_v28 }
 0x283   : > { %v1531_v52 = vpop.permute.xlu0 %1530  ;;  %v2020_v51 = vsel %vm1992_vm12, %v1987_v7, %v1741_v56 }
 0x284   : > { %v1858_v14 = vsel %vm1828_vm8, %v1825_v9, %v1531_v52  ;;  %v1485_v32 = vpop.permute.xlu1 %1484 }
 0x285   : > { %v1827_v54 = vsel %vm1795_vm7, %v1794_v53, %v1485_v32  ;;  %3083 = vmatmul.mubr.msk.bf16.gmra.mrb[40].mxu1 %vm2045_vm13, %v2020_v51  ;;  %v1890_v36 = vsel %vm499_vm0, %v1858_v14, %v1579_v47 }
 0x286   : > { %v1860_v38 = vsel %vm1828_vm8, %v1827_v54, %v1533_v12 }
 0x287   : > { %v1892_v25 = vsel %vm499_vm0, %v1860_v38, %v1581_v39  ;;  %v1627_v28 = vpop.permute.xlu0 %1626 }
 0x288   : > { %v1923_v34 = vsel %vm1893_vm10, %v1890_v36, %v1627_v28  ;;  %v1925_v50 = vsel %vm1893_vm10, %v1892_v25, %v1629_v4  ;;  %v1711_v44 = vpop.permute.xlu1 %1710 }
 0x289   : > { %v1956_v19 = vsel %vm1926_vm9, %v1923_v34, %v1675_v41  ;;  %v1958_v0 = vsel %vm1926_vm9, %v1925_v50, %v1677_v27 }
 0x28a   : > { %v1989_v22 = vsel %vm1959_vm11, %v1956_v19, %v1709_v24  ;;  %v1991_v18 = vsel %vm1959_vm11, %v1958_v0, %v1711_v44 }
 0x28b   : > { %v1743_v10 = vpop.permute.xlu0 %1742 }
 0x28c   : > { %v2022_v48 = vsel %vm1992_vm12, %v1989_v22, %v1743_v10  ;;  %v1745_v5 = vpop.permute.xlu1 %1744 }
 0x28d   : > { %v2024_v3 = vsel %vm1992_vm12, %v1991_v18, %v1745_v5  ;;  %3086 = vmatprep.mubr.msk.bf16.mxu1 %vm2045_vm13, %v2022_v48 }
 0x28e   : > { %3087 = vmatmul.mubr.msk.bf16.gmra.mrb[44].mxu1 %vm2045_vm13, %v2024_v3 }
 0x2d0   : > { %v3060_v16 = vpop.f32.mrb[16].mxu1 }
 0x2d1   : > { %v2252_v55 = vmul.f32 %v3060_v16, %v4533_v45  ;;  %v2116_v1 = vpop.f32.mrb[17].mxu1 }
 0x2d2   : > { %v2250_v57 = vmul.f32 %v4533_v45, %v2116_v1  ;;  %v3061_v8 = vpop.f32.mrb[18].mxu1 }
 0x2d3   : > { %v2291_v35 = vadd.f32 %v4538_v21, %v2252_v55  ;;  %v2253_v2 = vmul.f32 %v3061_v8, %v4533_v45  ;;  %v2119_v11 = vpop.f32.mrb[19].mxu1 }
 0x2d4   : > { %v2289_v62 = vadd.f32 %v4538_v21, %v2250_v57  ;;  %v2251_v33 = vmul.f32 %v4533_v45, %v2119_v11 }
 0x2d5   : > { %v2292_v20 = vadd.f32 %v4538_v21, %v2253_v2  ;;  %v2323_v49 = vmax.f32 %v2291_v35, 0.0 }
 0x2d6   : > { %v2290_v30 = vadd.f32 %v4538_v21, %v2251_v33  ;;  %v2321_v60 = vmax.f32 %v2289_v62, 0.0 }
 0x2d7   : > { %v2324_v59 = vmax.f32 %v2292_v20, 0.0 }
 0x2d8   : > { %v2322_v6 = vmax.f32 %v2290_v30, 0.0 }
 0x2d9   : > { %v2354_v15 = vpack.c.bf16 %v2324_v59, %v2323_v49 }
 0x2da   : > { %v2353_v13 = vpack.c.bf16 %v2322_v6, %v2321_v60 }
 0x2dc   : > { %3092 = vmatprep.mubr.msk.bf16.mxu0 %vm1746_vm6, %v2353_v13 }
 0x2dd   : > { %3093 = vmatmul.mubr.msk.bf16.vlgmr.msra.gmra.mrb[16].mxu0 %vm1746_vm6, %v2354_v15 }
 0x30a   : > { %v3064_v26 = vpop.f32.mrb[20].mxu1 }
 0x30b   : > { %v2256_v31 = vmul.f32 %v3064_v26, %v4533_v45  ;;  %v2132_v46 = vpop.f32.mrb[21].mxu1 }
 0x30c   : > { %v2254_v40 = vmul.f32 %v4533_v45, %v2132_v46  ;;  %v3065_v23 = vpop.f32.mrb[22].mxu1 }
 0x30d   : > { %v2295_v63 = vadd.f32 %v4538_v21, %v2256_v31  ;;  %v2257_v42 = vmul.f32 %v3065_v23, %v4533_v45  ;;  %v2135_v12 = vpop.f32.mrb[23].mxu1 }
 0x30e   : > { %v2293_v47 = vadd.f32 %v4538_v21, %v2254_v40  ;;  %v2255_v39 = vmul.f32 %v4533_v45, %v2135_v12 }
 0x30f   : > { %v2296_v41 = vadd.f32 %v4538_v21, %v2257_v42  ;;  %v2327_v24 = vmax.f32 %v2295_v63, 0.0 }
 0x310   : > { %v2294_v4 = vadd.f32 %v4538_v21, %v2255_v39  ;;  %v2325_v27 = vmax.f32 %v2293_v47, 0.0 }
 0x311   : > { %v2328_v61 = vmax.f32 %v2296_v41, 0.0 }
 0x312   : > { %v2326_v29 = vmax.f32 %v2294_v4, 0.0 }
 0x313   : > { %v2356_v56 = vpack.c.bf16 %v2328_v61, %v2327_v24 }
 0x314   : > { %v2355_v58 = vpack.c.bf16 %v2326_v29, %v2325_v27 }
 0x316   : > { %3096 = vmatprep.mubr.msk.bf16.mxu0 %vm1746_vm6, %v2355_v58 }
 0x317   : > { %3097 = vmatmul.mubr.msk.bf16.gmra.mrb[20].mxu0 %vm1746_vm6, %v2356_v56 }
 0x336   : > { %v3068_v37 = vpop.f32.mrb[24].mxu1 }
 0x337   : > { %v2260_v43 = vmul.f32 %v3068_v37, %v4533_v45  ;;  %v2148_v17 = vpop.f32.mrb[25].mxu1 }
 0x338   : > { %v2258_v7 = vmul.f32 %v4533_v45, %v2148_v17  ;;  %v3069_v9 = vpop.f32.mrb[26].mxu1 }
 0x339   : > { %v2299_v52 = vadd.f32 %v4538_v21, %v2260_v43  ;;  %v2261_v53 = vmul.f32 %v3069_v9, %v4533_v45  ;;  %v2151_v14 = vpop.f32.mrb[27].mxu1 }
 0x33a   : > { %v2297_v32 = vadd.f32 %v4538_v21, %v2258_v7  ;;  %v2259_v51 = vmul.f32 %v4533_v45, %v2151_v14 }
 0x33b   : > { %v2300_v54 = vadd.f32 %v4538_v21, %v2261_v53  ;;  %v2331_v25 = vmax.f32 %v2299_v52, 0.0 }
 0x33c   : > { %v2298_v38 = vadd.f32 %v4538_v21, %v2259_v51  ;;  %v2329_v36 = vmax.f32 %v2297_v32, 0.0 }
 0x33d   : > { %v2332_v28 = vmax.f32 %v2300_v54, 0.0 }
 0x33e   : > { %v2330_v34 = vmax.f32 %v2298_v38, 0.0 }
 0x33f   : > { %v2358_v50 = vpack.c.bf16 %v2332_v28, %v2331_v25 }
 0x340   : > { %v2357_v44 = vpack.c.bf16 %v2330_v34, %v2329_v36  ;;  %v3072_v19 = vpop.f32.mrb[28].mxu1 }
 0x341   : > { %v2264_v0 = vmul.f32 %v3072_v19, %v4533_v45  ;;  %v2164_v22 = vpop.f32.mrb[29].mxu1 }
 0x342   : > { %v2262_v10 = vmul.f32 %v4533_v45, %v2164_v22  ;;  %v3073_v18 = vpop.f32.mrb[30].mxu1  ;;  %3100 = vmatprep.mubr.msk.bf16.mxu0 %vm1746_vm6, %v2357_v44 }
 0x343   : > { %v2303_v48 = vadd.f32 %v4538_v21, %v2264_v0  ;;  %v2265_v5 = vmul.f32 %v3073_v18, %v4533_v45  ;;  %v2167_v3 = vpop.f32.mrb[31].mxu1  ;;  %3101 = vmatmul.mubr.msk.bf16.gmra.mrb[24].mxu0 %vm1746_vm6, %v2358_v50 }
 0x344   : > { %v2301_v16 = vadd.f32 %v4538_v21, %v2262_v10  ;;  %v2263_v55 = vmul.f32 %v4533_v45, %v2167_v3 }
 0x345   : > { %v2304_v1 = vadd.f32 %v4538_v21, %v2265_v5  ;;  %v2335_v8 = vmax.f32 %v2303_v48, 0.0 }
 0x346   : > { %v2302_v57 = vadd.f32 %v4538_v21, %v2263_v55  ;;  %v2333_v2 = vmax.f32 %v2301_v16, 0.0 }
 0x347   : > { %v2336_v35 = vmax.f32 %v2304_v1, 0.0 }
 0x348   : > { %v2334_v11 = vmax.f32 %v2302_v57, 0.0  ;;  %v3076_v62 = vpop.f32.mrb[32].mxu1 }
 0x349   : > { %v2360_v33 = vpack.c.bf16 %v2336_v35, %v2335_v8  ;;  %v2268_v20 = vmul.f32 %v3076_v62, %v4533_v45  ;;  %v2180_v30 = vpop.f32.mrb[33].mxu1 }
 0x34a   : > { %v2359_v49 = vpack.c.bf16 %v2334_v11, %v2333_v2  ;;  %v2266_v59 = vmul.f32 %v4533_v45, %v2180_v30  ;;  %v3077_v60 = vpop.f32.mrb[34].mxu1 }
 0x34b   : > { %v2307_v6 = vadd.f32 %v4538_v21, %v2268_v20  ;;  %v2269_v15 = vmul.f32 %v3077_v60, %v4533_v45  ;;  %v2183_v13 = vpop.f32.mrb[35].mxu1 }
 0x34c   : > { %v2305_v26 = vadd.f32 %v4538_v21, %v2266_v59  ;;  %v2267_v31 = vmul.f32 %v4533_v45, %v2183_v13  ;;  %3104 = vmatprep.mubr.msk.bf16.mxu0 %vm1746_vm6, %v2359_v49 }
 0x34d   : > { %v2308_v46 = vadd.f32 %v4538_v21, %v2269_v15  ;;  %3105 = vmatmul.mubr.msk.bf16.gmra.mrb[28].mxu0 %vm1746_vm6, %v2360_v33  ;;  %v2339_v23 = vmax.f32 %v2307_v6, 0.0 }
 0x34e   : > { %v2306_v40 = vadd.f32 %v4538_v21, %v2267_v31  ;;  %v2337_v42 = vmax.f32 %v2305_v26, 0.0 }
 0x34f   : > { %v2340_v63 = vmax.f32 %v2308_v46, 0.0 }
 0x350   : > { %v2338_v12 = vmax.f32 %v2306_v40, 0.0  ;;  %v3080_v47 = vpop.f32.mrb[36].mxu1 }
 0x351   : > { %v2362_v39 = vpack.c.bf16 %v2340_v63, %v2339_v23  ;;  %v2272_v41 = vmul.f32 %v3080_v47, %v4533_v45  ;;  %v2196_v4 = vpop.f32.mrb[37].mxu1  ;;  %v3222_v23 = vld [vmem:[%s3513_s23 + $0x8] sm:$0xff]  }
 0x352   : > { %v2361_v24 = vpack.c.bf16 %v2338_v12, %v2337_v42  ;;  %v2270_v61 = vmul.f32 %v4533_v45, %v2196_v4  ;;  %v3081_v27 = vpop.f32.mrb[38].mxu1  ;;  %v2662_v63 = vunpack.c.l.bf16 %v3222_v23  ;;  %v3223_v12 = vld [vmem:[%s3513_s23] sm:$0xff]  }
 0x353   : > { %v2311_v29 = vadd.f32 %v4538_v21, %v2272_v41  ;;  %v2273_v56 = vmul.f32 %v3081_v27, %v4533_v45  ;;  %v2199_v58 = vpop.f32.mrb[39].mxu1  ;;  %v2660_v47 = vunpack.c.l.bf16 %v3223_v12 }
 0x354   : > { %v2309_v37 = vadd.f32 %v4538_v21, %v2270_v61  ;;  %v2271_v43 = vmul.f32 %v4533_v45, %v2199_v58  ;;  %3108 = vmatprep.mubr.msk.bf16.mxu0 %vm1746_vm6, %v2361_v24  ;;  %v2663_v61 = vunpack.c.h.bf16 %v3222_v23 }
 0x355   : > { %v2312_v17 = vadd.f32 %v4538_v21, %v2273_v56  ;;  %3109 = vmatmul.mubr.msk.bf16.gmra.mrb[32].mxu0 %vm1746_vm6, %v2362_v39  ;;  %v2343_v9 = vmax.f32 %v2311_v29, 0.0  ;;  %v2661_v29 = vunpack.c.h.bf16 %v3223_v12 }
 0x356   : > { %v2310_v7 = vadd.f32 %v4538_v21, %v2271_v43  ;;  %v2341_v53 = vmax.f32 %v2309_v37, 0.0 }
 0x357   : > { %v2344_v52 = vmax.f32 %v2312_v17, 0.0 }
 0x358   : > { %v2342_v14 = vmax.f32 %v2310_v7, 0.0  ;;  %v3084_v32 = vpop.f32.mrb[40].mxu1 }
 0x359   : > { %v2364_v51 = vpack.c.bf16 %v2344_v52, %v2343_v9  ;;  %v2276_v54 = vmul.f32 %v3084_v32, %v4533_v45  ;;  %v2212_v38 = vpop.f32.mrb[41].mxu1 }
 0x35a   : > { %v2363_v25 = vpack.c.bf16 %v2342_v14, %v2341_v53  ;;  %v2274_v28 = vmul.f32 %v4533_v45, %v2212_v38  ;;  %v3085_v36 = vpop.f32.mrb[42].mxu1 }
 0x35b   : > { %v2315_v34 = vadd.f32 %v4538_v21, %v2276_v54  ;;  %v2277_v50 = vmul.f32 %v3085_v36, %v4533_v45  ;;  %v2215_v44 = vpop.f32.mrb[43].mxu1 }
 0x35c   : > { %v2313_v19 = vadd.f32 %v4538_v21, %v2274_v28  ;;  %v2275_v0 = vmul.f32 %v4533_v45, %v2215_v44  ;;  %3112 = vmatprep.mubr.msk.bf16.mxu0 %vm1746_vm6, %v2363_v25  ;;  %v3224_v25 = vld [vmem:[%s3513_s23 + $0x18] sm:$0xff]  }
 0x35d   : > { %v2316_v22 = vadd.f32 %v4538_v21, %v2277_v50  ;;  %3113 = vmatmul.mubr.msk.bf16.gmra.mrb[36].mxu0 %vm1746_vm6, %v2364_v51  ;;  %v2347_v18 = vmax.f32 %v2315_v34, 0.0  ;;  %v2666_v28 = vunpack.c.l.bf16 %v3224_v25  ;;  %v3225_v50 = vld [vmem:[%s3513_s23 + $0x10] sm:$0xff]  }
 0x35e   : > { %v2314_v10 = vadd.f32 %v4538_v21, %v2275_v0  ;;  %v2345_v5 = vmax.f32 %v2313_v19, 0.0  ;;  %v2664_v44 = vunpack.c.l.bf16 %v3225_v50 }
 0x35f   : > { %v2348_v48 = vmax.f32 %v2316_v22, 0.0 }
 0x360   : > { %v2346_v3 = vmax.f32 %v2314_v10, 0.0  ;;  %v2667_v10 = vunpack.c.h.bf16 %v3224_v25 }
 0x361   : > { %v2366_v16 = vpack.c.bf16 %v2348_v48, %v2347_v18  ;;  %v3088_v55 = vpop.f32.mrb[44].mxu1 }
 0x362   : > { %v2365_v1 = vpack.c.bf16 %v2346_v3, %v2345_v5  ;;  %v2280_v57 = vmul.f32 %v3088_v55, %v4533_v45  ;;  %v2228_v8 = vpop.f32.mrb[45].mxu1  ;;  %v2665_v3 = vunpack.c.h.bf16 %v3225_v50 }
 0x363   : > { %v2278_v35 = vmul.f32 %v4533_v45, %v2228_v8  ;;  %v3089_v2 = vpop.f32.mrb[46].mxu1 }
 0x364   : > { %v2319_v11 = vadd.f32 %v4538_v21, %v2280_v57  ;;  %v2281_v62 = vmul.f32 %v3089_v2, %v4533_v45  ;;  %v2231_v33 = vpop.f32.mrb[47].mxu1  ;;  %3116 = vmatprep.mubr.msk.bf16.mxu0 %vm1746_vm6, %v2365_v1 }
 0x365   : > { %v2317_v20 = vadd.f32 %v4538_v21, %v2278_v35  ;;  %v2279_v30 = vmul.f32 %v4533_v45, %v2231_v33  ;;  %3117 = vmatmul.mubr.msk.bf16.gmra.mrb[40].mxu0 %vm1746_vm6, %v2366_v16  ;;  %v4623_v45 = vld [vmem:[%s4837_s8] ss:$0 sm:$0xff] }
 0x366   : > { %v2320_v49 = vadd.f32 %v4538_v21, %v2281_v62  ;;  %v2351_v60 = vmax.f32 %v2319_v11, 0.0 }
 0x367   : > { %v2318_v59 = vadd.f32 %v4538_v21, %v2279_v30  ;;  %v2349_v15 = vmax.f32 %v2317_v20, 0.0  ;;  %v4628_v21 = vld [vmem:[%s4838_s9] ss:$0 sm:$0xff] }
 0x368   : > { %v2352_v6 = vmax.f32 %v2320_v49, 0.0  ;;  %v3226_v49 = vld [vmem:[%s3513_s23 + $0x28] sm:$0xff]  }
 0x369   : > { %v2350_v13 = vmax.f32 %v2318_v59, 0.0  ;;  %v2670_v59 = vunpack.c.l.bf16 %v3226_v49 }
 0x36a   : > { %v2368_v26 = vpack.c.bf16 %v2352_v6, %v2351_v60 }
 0x36b   : > { %v2367_v31 = vpack.c.bf16 %v2350_v13, %v2349_v15  ;;  %v3227_v15 = vld [vmem:[%s3513_s23 + $0x20] sm:$0xff]  }
 0x36c   : > { %v2668_v13 = vunpack.c.l.bf16 %v3227_v15  ;;  %v2669_v12 = vunpack.c.h.bf16 %v3227_v15 }
 0x36d   : > { %3120 = vmatprep.mubr.msk.bf16.mxu0 %vm1746_vm6, %v2367_v31 }
 0x36e   : > { %3121 = vmatmul.mubr.msk.bf16.gmra.mrb[44].mxu0 %vm1746_vm6, %v2368_v26 }
 0x3b0   : > { %v3094_v46 = vpop.f32.mrb[16].mxu0 }
 0x3b1   : > { %v2591_v40 = vmul.f32 %v3094_v46, %v4623_v45  ;;  %v2455_v42 = vpop.f32.mrb[17].mxu0 }
 0x3b2   : > { %v2589_v39 = vmul.f32 %v4623_v45, %v2455_v42  ;;  %v3095_v41 = vpop.f32.mrb[18].mxu0 }
 0x3b3   : > { %v2630_v4 = vadd.f32 %v4628_v21, %v2591_v40  ;;  %v2592_v24 = vmul.f32 %v3095_v41, %v4623_v45  ;;  %v2458_v27 = vpop.f32.mrb[19].mxu0  ;;  %v2671_v40 = vunpack.c.h.bf16 %v3226_v49 }
 0x3b4   : > { %v2628_v56 = vadd.f32 %v4628_v21, %v2589_v39  ;;  %v2590_v58 = vmul.f32 %v4623_v45, %v2458_v27 }
 0x3b5   : > { %v2694_v37 = vadd.f32 %v2662_v63, %v2630_v4  ;;  %v2631_v43 = vadd.f32 %v4628_v21, %v2592_v24 }
 0x3b6   : > { %v2692_v17 = vadd.f32 %v2660_v47, %v2628_v56  ;;  %v2629_v7 = vadd.f32 %v4628_v21, %v2590_v58 }
 0x3b7   : > { %v2726_v9 = vmax.f32 %v2694_v37, 0.0  ;;  %v2695_v52 = vadd.f32 %v2663_v61, %v2631_v43 }
 0x3b8   : > { %v2724_v53 = vmax.f32 %v2692_v17, 0.0  ;;  %v2693_v14 = vadd.f32 %v2661_v29, %v2629_v7  ;;  %v3228_v17 = vld [vmem:[%s3513_s23 + $0x38] sm:$0xff]  }
 0x3b9   : > { %2758 = vst.msk [vmem:[%s4641_s12 + $0x10] sm:$0xff] %vm499_vm0, %v2726_v9  ;;  %v2727_v32 = vmax.f32 %v2695_v52, 0.0  ;;  %v2674_v7 = vunpack.c.l.bf16 %v3228_v17 }
 0x3ba   : > { %2756 = vst.msk [vmem:[%s4641_s12] sm:$0xff] %vm499_vm0, %v2724_v53  ;;  %v2725_v51 = vmax.f32 %v2693_v14, 0.0  ;;  %v3229_v53 = vld [vmem:[%s3513_s23 + $0x30] sm:$0xff]  }
 0x3bb   : > { %2759 = vst.msk [vmem:[%s4641_s12 + $0x18] sm:$0xff] %vm499_vm0, %v2727_v32  ;;  %v2672_v14 = vunpack.c.l.bf16 %v3229_v53 }
 0x3bc   : > { %2757 = vst.msk [vmem:[%s4641_s12 + $0x8] sm:$0xff] %vm499_vm0, %v2725_v51 }
 0x3ea   : > { %v3098_v54 = vpop.f32.mrb[20].mxu0 }
 0x3eb   : > { %v2595_v38 = vmul.f32 %v3098_v54, %v4623_v45  ;;  %v2471_v36 = vpop.f32.mrb[21].mxu0 }
 0x3ec   : > { %v2593_v34 = vmul.f32 %v4623_v45, %v2471_v36  ;;  %v3099_v19 = vpop.f32.mrb[22].mxu0 }
 0x3ed   : > { %v2634_v0 = vadd.f32 %v4628_v21, %v2595_v38  ;;  %v2596_v22 = vmul.f32 %v3099_v19, %v4623_v45  ;;  %v2474_v18 = vpop.f32.mrb[23].mxu0  ;;  %v2675_v38 = vunpack.c.h.bf16 %v3228_v17 }
 0x3ee   : > { %v2632_v48 = vadd.f32 %v4628_v21, %v2593_v34  ;;  %v2594_v5 = vmul.f32 %v4623_v45, %v2474_v18  ;;  %v2673_v34 = vunpack.c.h.bf16 %v3229_v53 }
 0x3ef   : > { %v2698_v16 = vadd.f32 %v2666_v28, %v2634_v0  ;;  %v2635_v55 = vadd.f32 %v4628_v21, %v2596_v22 }
 0x3f0   : > { %v2696_v1 = vadd.f32 %v2664_v44, %v2632_v48  ;;  %v2633_v57 = vadd.f32 %v4628_v21, %v2594_v5 }
 0x3f1   : > { %v2730_v8 = vmax.f32 %v2698_v16, 0.0  ;;  %v2699_v35 = vadd.f32 %v2667_v10, %v2635_v55  ;;  %v3230_v55 = vld [vmem:[%s3513_s23 + $0x48] sm:$0xff]  }
 0x3f2   : > { %v2728_v2 = vmax.f32 %v2696_v1, 0.0  ;;  %v2697_v11 = vadd.f32 %v2665_v3, %v2633_v57  ;;  %v2678_v1 = vunpack.c.l.bf16 %v3230_v55 }
 0x3f3   : > { %2762 = vst.msk [vmem:[%s4641_s12 + $0x30] sm:$0xff] %vm499_vm0, %v2730_v8  ;;  %v2731_v62 = vmax.f32 %v2699_v35, 0.0  ;;  %v3231_v8 = vld [vmem:[%s3513_s23 + $0x40] sm:$0xff]  }
 0x3f4   : > { %2760 = vst.msk [vmem:[%s4641_s12 + $0x20] sm:$0xff] %vm499_vm0, %v2728_v2  ;;  %v2729_v33 = vmax.f32 %v2697_v11, 0.0  ;;  %v2676_v35 = vunpack.c.l.bf16 %v3231_v8 }
 0x3f5   : > { %2763 = vst.msk [vmem:[%s4641_s12 + $0x38] sm:$0xff] %vm499_vm0, %v2731_v62 }
 0x3f6   : > { %2761 = vst.msk [vmem:[%s4641_s12 + $0x28] sm:$0xff] %vm499_vm0, %v2729_v33 }
 0x416   : > { %v3102_v20 = vpop.f32.mrb[24].mxu0 }
 0x417   : > { %v2599_v30 = vmul.f32 %v3102_v20, %v4623_v45  ;;  %v2487_v60 = vpop.f32.mrb[25].mxu0 }
 0x418   : > { %v2597_v6 = vmul.f32 %v4623_v45, %v2487_v60  ;;  %v3103_v26 = vpop.f32.mrb[26].mxu0 }
 0x419   : > { %v2638_v31 = vadd.f32 %v4628_v21, %v2599_v30  ;;  %v2600_v46 = vmul.f32 %v3103_v26, %v4623_v45  ;;  %v2490_v23 = vpop.f32.mrb[27].mxu0  ;;  %v2679_v30 = vunpack.c.h.bf16 %v3230_v55 }
 0x41a   : > { %v2636_v63 = vadd.f32 %v4628_v21, %v2597_v6  ;;  %v2598_v42 = vmul.f32 %v4623_v45, %v2490_v23 }
 0x41b   : > { %v2702_v47 = vadd.f32 %v2670_v59, %v2638_v31  ;;  %v2639_v39 = vadd.f32 %v4628_v21, %v2600_v46  ;;  %v2677_v59 = vunpack.c.h.bf16 %v3231_v8 }
 0x41c   : > { %v2700_v41 = vadd.f32 %v2668_v13, %v2636_v63  ;;  %v2637_v4 = vadd.f32 %v4628_v21, %v2598_v42 }
 0x41d   : > { %v2734_v24 = vmax.f32 %v2702_v47, 0.0  ;;  %v2703_v61 = vadd.f32 %v2671_v40, %v2639_v39  ;;  %v3232_v39 = vld [vmem:[%s3513_s23 + $0x58] sm:$0xff]  }
 0x41e   : > { %v2732_v27 = vmax.f32 %v2700_v41, 0.0  ;;  %v2701_v29 = vadd.f32 %v2669_v12, %v2637_v4  ;;  %v2682_v41 = vunpack.c.l.bf16 %v3232_v39 }
 0x41f   : > { %2766 = vst.msk [vmem:[%s4641_s12 + $0x50] sm:$0xff] %vm499_vm0, %v2734_v24  ;;  %v2735_v56 = vmax.f32 %v2703_v61, 0.0 }
 0x420   : > { %2764 = vst.msk [vmem:[%s4641_s12 + $0x40] sm:$0xff] %vm499_vm0, %v2732_v27  ;;  %v2733_v58 = vmax.f32 %v2701_v29, 0.0  ;;  %v3106_v37 = vpop.f32.mrb[28].mxu0  ;;  %v3233_v27 = vld [vmem:[%s3513_s23 + $0x50] sm:$0xff]  }
 0x421   : > { %2767 = vst.msk [vmem:[%s4641_s12 + $0x58] sm:$0xff] %vm499_vm0, %v2735_v56  ;;  %v2603_v43 = vmul.f32 %v3106_v37, %v4623_v45  ;;  %v2503_v9 = vpop.f32.mrb[29].mxu0  ;;  %v2680_v29 = vunpack.c.l.bf16 %v3233_v27 }
 0x422   : > { %2765 = vst.msk [vmem:[%s4641_s12 + $0x48] sm:$0xff] %vm499_vm0, %v2733_v58  ;;  %v2601_v52 = vmul.f32 %v4623_v45, %v2503_v9  ;;  %v3107_v32 = vpop.f32.mrb[30].mxu0 }
 0x423   : > { %v2642_v51 = vadd.f32 %v4628_v21, %v2603_v43  ;;  %v2604_v54 = vmul.f32 %v3107_v32, %v4623_v45  ;;  %v2506_v25 = vpop.f32.mrb[31].mxu0  ;;  %v2683_v43 = vunpack.c.h.bf16 %v3232_v39 }
 0x424   : > { %v2640_v28 = vadd.f32 %v4628_v21, %v2601_v52  ;;  %v2602_v36 = vmul.f32 %v4623_v45, %v2506_v25  ;;  %v2681_v52 = vunpack.c.h.bf16 %v3233_v27 }
 0x425   : > { %v2706_v50 = vadd.f32 %v2674_v7, %v2642_v51  ;;  %v2643_v44 = vadd.f32 %v4628_v21, %v2604_v54 }
 0x426   : > { %v2704_v19 = vadd.f32 %v2672_v14, %v2640_v28  ;;  %v2641_v0 = vadd.f32 %v4628_v21, %v2602_v36 }
 0x427   : > { %v2738_v22 = vmax.f32 %v2706_v50, 0.0  ;;  %v2707_v10 = vadd.f32 %v2675_v38, %v2643_v44  ;;  %v3234_v44 = vld [vmem:[%s3513_s23 + $0x68] sm:$0xff]  }
 0x428   : > { %v2736_v18 = vmax.f32 %v2704_v19, 0.0  ;;  %v2705_v48 = vadd.f32 %v2673_v34, %v2641_v0  ;;  %v3110_v5 = vpop.f32.mrb[32].mxu0  ;;  %v2686_v19 = vunpack.c.l.bf16 %v3234_v44  ;;  %v2687_v55 = vunpack.c.h.bf16 %v3234_v44 }
 0x429   : > { %2770 = vst.msk [vmem:[%s4641_s12 + $0x70] sm:$0xff] %vm499_vm0, %v2738_v22  ;;  %v2739_v3 = vmax.f32 %v2707_v10, 0.0  ;;  %v2607_v16 = vmul.f32 %v3110_v5, %v4623_v45  ;;  %v2519_v57 = vpop.f32.mrb[33].mxu0 }
 0x42a   : > { %2768 = vst.msk [vmem:[%s4641_s12 + $0x60] sm:$0xff] %vm499_vm0, %v2736_v18  ;;  %v2737_v2 = vmax.f32 %v2705_v48, 0.0  ;;  %v2605_v11 = vmul.f32 %v4623_v45, %v2519_v57  ;;  %v3111_v62 = vpop.f32.mrb[34].mxu0  ;;  %v3235_v18 = vld [vmem:[%s3513_s23 + $0x60] sm:$0xff]  }
 0x42b   : > { %2771 = vst.msk [vmem:[%s4641_s12 + $0x78] sm:$0xff] %vm499_vm0, %v2739_v3  ;;  %v2646_v33 = vadd.f32 %v4628_v21, %v2607_v16  ;;  %v2608_v20 = vmul.f32 %v3111_v62, %v4623_v45  ;;  %v2522_v49 = vpop.f32.mrb[35].mxu0  ;;  %v2684_v48 = vunpack.c.l.bf16 %v3235_v18 }
 0x42c   : > { %2769 = vst.msk [vmem:[%s4641_s12 + $0x68] sm:$0xff] %vm499_vm0, %v2737_v2  ;;  %v2644_v60 = vadd.f32 %v4628_v21, %v2605_v11  ;;  %v2606_v6 = vmul.f32 %v4623_v45, %v2522_v49 }
 0x42d   : > { %v2710_v15 = vadd.f32 %v2678_v1, %v2646_v33  ;;  %v2647_v13 = vadd.f32 %v4628_v21, %v2608_v20 }
 0x42e   : > { %v2708_v26 = vadd.f32 %v2676_v35, %v2644_v60  ;;  %v2645_v31 = vadd.f32 %v4628_v21, %v2606_v6  ;;  %v2685_v35 = vunpack.c.h.bf16 %v3235_v18 }
 0x42f   : > { %v2742_v46 = vmax.f32 %v2710_v15, 0.0  ;;  %v2711_v40 = vadd.f32 %v2679_v30, %v2647_v13 }
 0x430   : > { %v2740_v23 = vmax.f32 %v2708_v26, 0.0  ;;  %v2709_v63 = vadd.f32 %v2677_v59, %v2645_v31  ;;  %v3114_v42 = vpop.f32.mrb[36].mxu0  ;;  %v3236_v26 = vld [vmem:[%s3513_s23 + $0x78] sm:$0xff]  }
 0x431   : > { %2774 = vst.msk [vmem:[%s4641_s12 + $0x90] sm:$0xff] %vm499_vm0, %v2742_v46  ;;  %v2743_v12 = vmax.f32 %v2711_v40, 0.0  ;;  %v2611_v47 = vmul.f32 %v3114_v42, %v4623_v45  ;;  %v2535_v4 = vpop.f32.mrb[37].mxu0  ;;  %v2690_v31 = vunpack.c.l.bf16 %v3236_v26  ;;  %v2691_v39 = vunpack.c.h.bf16 %v3236_v26 }
 0x432   : > { %2772 = vst.msk [vmem:[%s4641_s12 + $0x80] sm:$0xff] %vm499_vm0, %v2740_v23  ;;  %v2741_v24 = vmax.f32 %v2709_v63, 0.0  ;;  %v2609_v61 = vmul.f32 %v4623_v45, %v2535_v4  ;;  %v3115_v56 = vpop.f32.mrb[38].mxu0  ;;  %v3237_v23 = vld [vmem:[%s3513_s23 + $0x70] sm:$0xff]   ;;  %s2964_s23 = sshll.u32 %s3426_s17, 12  ;;  %s2789_s17 = scalar_lea.sflag [#allocation4], %s3509_s18 }
 0x433   : > { %2775 = vst.msk [vmem:[%s4641_s12 + $0x98] sm:$0xff] %vm499_vm0, %v2743_v12  ;;  %v2650_v58 = vadd.f32 %v4628_v21, %v2611_v47  ;;  %v2612_v37 = vmul.f32 %v3115_v56, %v4623_v45  ;;  %v2538_v17 = vpop.f32.mrb[39].mxu0  ;;  %v2688_v63 = vunpack.c.l.bf16 %v3237_v23  ;;  %s4776_s29 = scalar_lea.hbm %s4839_s10, %s2964_s23 }
 0x434   : > { %2773 = vst.msk [vmem:[%s4641_s12 + $0x88] sm:$0xff] %vm499_vm0, %v2741_v24  ;;  %v2648_v7 = vadd.f32 %v4628_v21, %v2609_v61  ;;  %v2610_v9 = vmul.f32 %v4623_v45, %v2538_v17  ;;  %v2689_v61 = vunpack.c.h.bf16 %v3237_v23 }
 0x435   : > { %v2714_v53 = vadd.f32 %v2682_v41, %v2650_v58  ;;  %v2651_v14 = vadd.f32 %v4628_v21, %v2612_v37 }
 0x436   : > { %v2712_v32 = vadd.f32 %v2680_v29, %v2648_v7  ;;  %v2649_v51 = vadd.f32 %v4628_v21, %v2610_v9 }
 0x437   : > { %v2746_v54 = vmax.f32 %v2714_v53, 0.0  ;;  %v2715_v38 = vadd.f32 %v2683_v43, %v2651_v14 }
 0x438   : > { %v2744_v25 = vmax.f32 %v2712_v32, 0.0  ;;  %v2713_v28 = vadd.f32 %v2681_v52, %v2649_v51  ;;  %v3118_v36 = vpop.f32.mrb[40].mxu0 }
 0x439   : > { %2778 = vst.msk [vmem:[%s4641_s12 + $0xb0] sm:$0xff] %vm499_vm0, %v2746_v54  ;;  %v2747_v34 = vmax.f32 %v2715_v38, 0.0  ;;  %v2615_v50 = vmul.f32 %v3118_v36, %v4623_v45  ;;  %v2551_v0 = vpop.f32.mrb[41].mxu0 }
 0x43a   : > { %2776 = vst.msk [vmem:[%s4641_s12 + $0xa0] sm:$0xff] %vm499_vm0, %v2744_v25  ;;  %v2745_v22 = vmax.f32 %v2713_v28, 0.0  ;;  %v2613_v10 = vmul.f32 %v4623_v45, %v2551_v0  ;;  %v3119_v5 = vpop.f32.mrb[42].mxu0 }
 0x43b   : > { %2779 = vst.msk [vmem:[%s4641_s12 + $0xb8] sm:$0xff] %vm499_vm0, %v2747_v34  ;;  %v2654_v3 = vadd.f32 %v4628_v21, %v2615_v50  ;;  %v2616_v16 = vmul.f32 %v3119_v5, %v4623_v45  ;;  %v2554_v1 = vpop.f32.mrb[43].mxu0 }
 0x43c   : > { %2777 = vst.msk [vmem:[%s4641_s12 + $0xa8] sm:$0xff] %vm499_vm0, %v2745_v22  ;;  %v2652_v57 = vadd.f32 %v4628_v21, %v2613_v10  ;;  %v2614_v8 = vmul.f32 %v4623_v45, %v2554_v1 }
 0x43d   : > { %v2718_v2 = vadd.f32 %v2686_v19, %v2654_v3  ;;  %v2655_v11 = vadd.f32 %v4628_v21, %v2616_v16 }
 0x43e   : > { %v2716_v62 = vadd.f32 %v2684_v48, %v2652_v57  ;;  %v2653_v33 = vadd.f32 %v4628_v21, %v2614_v8 }
 0x43f   : > { %v2750_v20 = vmax.f32 %v2718_v2, 0.0  ;;  %v2719_v30 = vadd.f32 %v2687_v55, %v2655_v11 }
 0x440   : > { %v2748_v49 = vmax.f32 %v2716_v62, 0.0  ;;  %v2717_v59 = vadd.f32 %v2685_v35, %v2653_v33 }
 0x441   : > { %2782 = vst.msk [vmem:[%s4641_s12 + $0xd0] sm:$0xff] %vm499_vm0, %v2750_v20  ;;  %v2751_v60 = vmax.f32 %v2719_v30, 0.0  ;;  %v3122_v6 = vpop.f32.mrb[44].mxu0 }
 0x442   : > { %2780 = vst.msk [vmem:[%s4641_s12 + $0xc0] sm:$0xff] %vm499_vm0, %v2748_v49  ;;  %v2749_v15 = vmax.f32 %v2717_v59, 0.0  ;;  %v2619_v13 = vmul.f32 %v3122_v6, %v4623_v45  ;;  %v2567_v46 = vpop.f32.mrb[45].mxu0 }
 0x443   : > { %2783 = vst.msk [vmem:[%s4641_s12 + $0xd8] sm:$0xff] %vm499_vm0, %v2751_v60  ;;  %v2617_v40 = vmul.f32 %v4623_v45, %v2567_v46  ;;  %v3123_v42 = vpop.f32.mrb[46].mxu0 }
 0x444   : > { %2781 = vst.msk [vmem:[%s4641_s12 + $0xc8] sm:$0xff] %vm499_vm0, %v2749_v15  ;;  %v2658_v12 = vadd.f32 %v4628_v21, %v2619_v13  ;;  %v2620_v47 = vmul.f32 %v3123_v42, %v4623_v45  ;;  %v2570_v41 = vpop.f32.mrb[47].mxu0 }
 0x445   : > { %v2656_v4 = vadd.f32 %v4628_v21, %v2617_v40  ;;  %v2618_v24 = vmul.f32 %v4623_v45, %v2570_v41 }
 0x446   : > { %v2722_v27 = vadd.f32 %v2690_v31, %v2658_v12  ;;  %v2659_v29 = vadd.f32 %v4628_v21, %v2620_v47 }
 0x447   : > { %v2720_v56 = vadd.f32 %v2688_v63, %v2656_v4  ;;  %v2657_v58 = vadd.f32 %v4628_v21, %v2618_v24 }
 0x448   : > { %v2754_v37 = vmax.f32 %v2722_v27, 0.0  ;;  %v2723_v43 = vadd.f32 %v2691_v39, %v2659_v29 }
 0x449   : > { %v2752_v17 = vmax.f32 %v2720_v56, 0.0  ;;  %v2721_v7 = vadd.f32 %v2689_v61, %v2657_v58 }
 0x44a   : > { %2786 = vst.msk [vmem:[%s4641_s12 + $0xf0] sm:$0xff] %vm499_vm0, %v2754_v37  ;;  %v2755_v45 = vmax.f32 %v2723_v43, 0.0 }
 0x44b   : > { %2784 = vst.msk [vmem:[%s4641_s12 + $0xe0] sm:$0xff] %vm499_vm0, %v2752_v17  ;;  %v2753_v9 = vmax.f32 %v2721_v7, 0.0 }
 0x44c   : > { %2787 = vst.msk [vmem:[%s4641_s12 + $0xf8] sm:$0xff] %vm499_vm0, %v2755_v45 }
 0x44d   : > { %2785 = vst.msk [vmem:[%s4641_s12 + $0xe8] sm:$0xff] %vm499_vm0, %v2753_v9 }
 0x44e   : > { %3281 = shalt.err (!%p3278_p2)
}
 0x44f   : > { %s3282_s12 = scalar_lea.hbm %s4776_s29, 4096  ;;  %s3286_s30 = scalar_lea.hbm %s4839_s10, 8192 }
 0x450   : > { %p3283_p4 = scmp.ne.s32.totalorder %s4776_s29, %s3282_s12  ;;  %p3287_p9 = scmp.lt.u32.totalorder %s4776_s29, %s4839_s10 }
 0x451   : > { %p3288_p1 = scmp.lt.u32.totalorder %s3286_s30, %s3282_s12  ;;  %p3290_p6 = scmp.lt.u32.totalorder %s3282_s12, %s4776_s29 }
 0x452   : > { %p3284_p5 = pnand %p3283_p4, %p4865_p11 }
 0x453   : > { %p3289_p3 = por %p3288_p1, %p3287_p9 }
 0x454   : > { %p3285_p7 = pneg %p3284_p5 }
 0x455   : > { %p3291_p12 = por %p3290_p6, %p3289_p3 }
 0x457   : > { %p3292_p13 = pnand %p3291_p12, %p3285_p7 }
 0x459   : > { %3295 = shalt.err (!%p3292_p13)
}
 0x45a   : > { %s3349_s27 = smov 128  }
 0x45b   : > { %3130 = dma.vmem_to_hbm [thread:$0]  (%p4865_p11), %s4780_s21, 4096, %s4776_s29, %s2789_s17, %s3349_s27, %s3349_s27, %s3340_s24  }
 0x45c PF: > { %s2817_s22 = sand.u32 1, %s3322_s13   ;;  %p4866_p8 = scmp.ne.s32.totalorder %s4852_s26, 0 }
 0x45d   : > { %p4867_p10 = scmp.ge.s32.totalorder %s3334_s16, 2  ;;  %s2818_s12 = scalar_lea.sflag [#allocation4], %s2817_s22 }
 0x45f   : > { %p3137_p0 = pnand %p4867_p10, %p4866_p8 }
 0x461   : > { %3317 = dma.done.wait (!%p3137_p0), %s2818_s12, 4096  }
 0x462   : > { %3319 = vsyncadd (!%p3137_p0), %s2818_s12, 4294963200  ;;  %s4868_s25 = sld [smem:[#allocation8_spill]]  ;;  %p23_p2 = scmp.ge.s32.totalorder %s3430_s19, 4  }
 0x463   : > { %s4869_s13 = smov %s3326_s14  ;;  %s4870_s14 = smov %s3330_s15 }
 0x464   : > { %s4872_s16 = smov %s3430_s19  ;;  %25 = sbr.rel (!%p23_p2) target bundleno = 5 (0x5), region = 105 }
 0x468   : > { %s4871_s15 = smov %s4868_s25 }
 0x46b   :  { %2823 = vsyncpa [#allocation3], 1 }
 0x46c   :  { %2825 = vsyncpa [#allocation3 + $0x1], 1 }
 0x46d   :  { %2826 = vsyncpa [#allocation4], 1 }
 0x46e   :  { %2828 = vsyncpa [#allocation4 + $0x1], 1 }

</bundles_post_ra>
